<compile_context>
chip_gen: v5e
topology: v5e:2x2
jax: 0.10.0
libtpu: 0.0.40
codegen_flags: <defaults>
</compile_context>

<pallas_src>
import jax
import jax.numpy as jnp
from jax.experimental import pallas as pl
from jax.experimental.pallas import tpu as pltpu

# ----------------------------- config (small, synthetic) --------------------
DIM_IN = 4            # channels of the pooled ROI feature
ROI_SIZE = 8          # CAR_CLS.ROI_XFORM_RESOLUTION
MLP_DIM_IN = 8        # flattened bbox feature dim
HIDDEN_1 = 128        # cfg.CAR_CLS.MLP_HEAD_DIM
HIDDEN_2 = 128        # cfg.TRANS_HEAD.MLP_HEAD_DIM
D_CONV = DIM_IN * ROI_SIZE * ROI_SIZE   # 256 (flattened conv feature)
MLP_PAD = 128                           # bbox features lane-padded to 128
H_PACKED = HIDDEN_1 + HIDDEN_2          # 256  ([h_conv | h_mlp])
DIM_OUT = HIDDEN_2 + HIDDEN_2           # 256  (torch.cat((x, x_b), dim=1))
N_ROIS = 200          # number of ROIs (deliberately not a power of two)
BLOCK_ROWS = 512      # row tile used only once N exceeds it


# ------------------------------- Pallas kernel ------------------------------
def _head_kernel(x_ref, bb_ref, w1c_ref, w1b_ref, b1_ref, w2_ref, b2_ref,
                 out_ref):
    # bf16 casts happen here (VPU, under the input DMA shadow).
    x = x_ref[...].astype(jnp.bfloat16)          # (tm, 256)
    bb = bb_ref[...].astype(jnp.bfloat16)        # (tm, 128)

    # Layer 1: dense K=256 conv block + K=128 bbox block, f32 accumulation.
    # Column-block-diagonal weights => h == [h_conv | h_mlp] (256 wide).
    h = jnp.dot(x, w1c_ref[...], preferred_element_type=jnp.float32)
    h = h + jnp.dot(bb, w1b_ref[...], preferred_element_type=jnp.float32)
    h = jnp.maximum(h + b1_ref[...], 0.0)        # f32 bias + ReLU

    # Layer 2: block-diagonal W2 => result is already concat(conv_out, mlp_out).
    o = jnp.dot(h.astype(jnp.bfloat16), w2_ref[...],
                preferred_element_type=jnp.float32)
    o = jnp.maximum(o + b2_ref[...], 0.0)

    out_ref[...] = o.astype(out_ref.dtype)       # single 256-lane store


# ------------------------------- wrapper -------------------------------------
def roi_trans_head_forward(x_pooled, bbox, packed_params, *,
                           block_rows=BLOCK_ROWS, out_dtype=jnp.bfloat16):
    """x_pooled: (N, C, roi, roi) f32 (NCHW, already ROI-transformed)
       bbox:     (N, MLP_DIM_IN)  f32
       packed_params: (w1_conv bf16, w1_bbox bf16, b1 f32, w2 bf16, b2 f32)
       returns:  (N, DIM_OUT) out_dtype
    """
    n = x_pooled.shape[0]
    w1c, w1b, b1, w2, b2 = packed_params

    # Free metadata reshape (== x.view(batch, -1)); stays f32 - the bf16 cast
    # is done inside the kernel.  bbox is lane-padded 8 -> 128 (tiny).
    x_flat = x_pooled.reshape(n, -1)
    bbox_pad = jnp.pad(bbox.reshape(n, -1),
                       ((0, 0), (0, MLP_PAD - bbox.reshape(n, -1).shape[1])))

    # One block for small N (no per-step overhead, no padded rows, no tail
    # slice); tile only when N is large enough that each step / each v7x TC
    # gets meaningful work.
    tm = n if n <= block_rows else block_rows
    grid = (pl.cdiv(n, tm),)

    flops = 2 * n * (D_CONV * H_PACKED + MLP_PAD * H_PACKED
                     + H_PACKED * DIM_OUT)
    bytes_accessed = (x_flat.size * 4 + bbox_pad.size * 4
                      + (w1c.size + w1b.size + w2.size) * 2
                      + (b1.size + b2.size) * 4
                      + n * DIM_OUT * jnp.dtype(out_dtype).itemsize)

    out = pl.pallas_call(
        _head_kernel,
        out_shape=jax.ShapeDtypeStruct((n, DIM_OUT), out_dtype),
        grid_spec=pltpu.PrefetchScalarGridSpec(
            num_scalar_prefetch=0,
            grid=grid,
            in_specs=[
                pl.BlockSpec((tm, D_CONV), lambda i: (i, 0)),    # conv rows
                pl.BlockSpec((tm, MLP_PAD), lambda i: (i, 0)),   # bbox rows
                pl.BlockSpec(w1c.shape, lambda i: (0, 0)),       # grid-invariant
                pl.BlockSpec(w1b.shape, lambda i: (0, 0)),
                pl.BlockSpec(b1.shape, lambda i: (0, 0)),
                pl.BlockSpec(w2.shape, lambda i: (0, 0)),
                pl.BlockSpec(b2.shape, lambda i: (0, 0)),
            ],
            out_specs=pl.BlockSpec((tm, DIM_OUT), lambda i: (i, 0)),
        ),
        compiler_params=pltpu.CompilerParams(
            dimension_semantics=("parallel",)),                  # v7x: 2 TCs
        cost_estimate=pl.CostEstimate(flops=flops, transcendentals=0,
                                      bytes_accessed=bytes_accessed),
    )(x_flat, bbox_pad, w1c, w1b, b1, w2, b2)

    return out


# ------------------------- deterministic parameter init ---------------------
def _xavier(key, fan_in, fan_out):
    # XavierFill-style uniform init; stored (fan_in, fan_out), i.e. already
    # transposed relative to PyTorch's nn.Linear (out, in) weight layout.
    limit = jnp.sqrt(6.0 / (fan_in + fan_out))
    return jax.random.uniform(key, (fan_in, fan_out), jnp.float32,
                              minval=-limit, maxval=limit)


def init_params(key):
    ks = jax.random.split(key, 4)
    return {
        "fc_conv_1_w": _xavier(ks[0], D_CONV, HIDDEN_1),
        "fc_conv_1_b": jnp.zeros((1, HIDDEN_1), jnp.float32),
        "fc_conv_2_w": _xavier(ks[1], HIDDEN_1, HIDDEN_2),
        "fc_conv_2_b": jnp.zeros((1, HIDDEN_2), jnp.float32),
        "fc_mlp_1_w": _xavier(ks[2], MLP_DIM_IN, HIDDEN_2),
        "fc_mlp_1_b": jnp.zeros((1, HIDDEN_2), jnp.float32),
        "fc_mlp_2_w": _xavier(ks[3], HIDDEN_2, HIDDEN_2),
        "fc_mlp_2_b": jnp.zeros((1, HIDDEN_2), jnp.float32),
    }


def pack_params(p):
    """Split/packed fused weights (built once, outside the hot path):
         w1_conv (256,256): cols [0:128]  = fc_conv_1_w, cols [128:256] = 0
         w1_bbox (128,256): cols [128:256] rows[0:8] = fc_mlp_1_w, rest 0
         w2      (256,256): block-diagonal [fc_conv_2_w, 0; 0, fc_mlp_2_w]
       Weights in bf16 (MXU-native), biases concatenated, f32."""
    w1c = jnp.zeros((D_CONV, H_PACKED), jnp.float32)
    w1c = w1c.at[:, :HIDDEN_1].set(p["fc_conv_1_w"])
    w1b = jnp.zeros((MLP_PAD, H_PACKED), jnp.float32)
    w1b = w1b.at[:MLP_DIM_IN, HIDDEN_1:].set(p["fc_mlp_1_w"])
    b1 = jnp.concatenate([p["fc_conv_1_b"], p["fc_mlp_1_b"]], axis=1)

    w2 = jnp.zeros((H_PACKED, DIM_OUT), jnp.float32)
    w2 = w2.at[:HIDDEN_1, :HIDDEN_2].set(p["fc_conv_2_w"])
    w2 = w2.at[HIDDEN_1:, HIDDEN_2:].set(p["fc_mlp_2_w"])
    b2 = jnp.concatenate([p["fc_conv_2_b"], p["fc_mlp_2_b"]], axis=1)

    return (w1c.astype(jnp.bfloat16), w1b.astype(jnp.bfloat16),
            b1.astype(jnp.float32),
            w2.astype(jnp.bfloat16), b2.astype(jnp.float32))


# ------------------------------ reference (pure JAX) -------------------------
def reference_forward(x_pooled, bbox, p):
    """Module semantics (two separate branches + concat), with the same bf16
    matmul-input precision the kernel uses (f32 accumulation / elementwise)."""
    def dot_bf16(a, w):
        return jnp.dot(a.astype(jnp.bfloat16), w.astype(jnp.bfloat16),
                       preferred_element_type=jnp.float32)
    n = x_pooled.shape[0]
    xf = x_pooled.reshape(n, -1)
    h = jnp.maximum(dot_bf16(xf, p["fc_conv_1_w"]) + p["fc_conv_1_b"], 0.0)
    h = jnp.maximum(dot_bf16(h, p["fc_conv_2_w"]) + p["fc_conv_2_b"], 0.0)
    m = jnp.maximum(dot_bf16(bbox.reshape(n, -1), p["fc_mlp_1_w"]) + p["fc_mlp_1_b"], 0.0)
    m = jnp.maximum(dot_bf16(m, p["fc_mlp_2_w"]) + p["fc_mlp_2_b"], 0.0)
    return jnp.concatenate([h, m], axis=1)


# ------------------------------------ main -----------------------------------
if __name__ == "__main__":
    key = jax.random.PRNGKey(0)
    k_x, k_b, k_p = jax.random.split(key, 3)

    # "x_pooled" stands for the ROI-pooled feature map (post roi_xform), NCHW.
    x_pooled = jax.random.normal(k_x, (N_ROIS, DIM_IN, ROI_SIZE, ROI_SIZE),
                                 jnp.float32)
    bbox = jax.random.normal(k_b, (N_ROIS, MLP_DIM_IN), jnp.float32)
    params = init_params(k_p)
    packed = pack_params(params)

    fwd = jax.jit(roi_trans_head_forward)   # lets XLA fuse the tiny wrapper ops
    out = fwd(x_pooled, bbox, packed)
    out = jax.block_until_ready(out)

    ref = reference_forward(x_pooled, bbox, params)
    assert out.shape == (N_ROIS, DIM_OUT)
    assert bool(jnp.allclose(out.astype(jnp.float32), ref,
                             atol=2e-2, rtol=2e-2))
    print("KERNEL_OK")
</pallas_src>

<mosaic_0001>
module attributes {stable_mosaic.version = 11 : i64} {
  func.func @_head_kernel(%arg0: i32, %arg1: memref<200x256xf32, #tpu.memory_space<vmem>>, %arg2: memref<200x128xf32, #tpu.memory_space<vmem>>, %arg3: memref<256x256xbf16, #tpu.memory_space<vmem>>, %arg4: memref<128x256xbf16, #tpu.memory_space<vmem>>, %arg5: memref<1x256xf32, #tpu.memory_space<vmem>>, %arg6: memref<256x256xbf16, #tpu.memory_space<vmem>>, %arg7: memref<1x256xf32, #tpu.memory_space<vmem>>, %arg8: memref<200x256xbf16, #tpu.memory_space<vmem>>) attributes {dimension_semantics = [#tpu.dimension_semantics<parallel>], iteration_bounds = array<i64: 1>, scalar_prefetch = 0 : i64, scratch_operands = 0 : i64, tpu.core_type = #tpu.core_type<tc>, window_params = [{transform_indices = @transform_0, window_bounds = array<i64: 200, 256>}, {transform_indices = @transform_1, window_bounds = array<i64: 200, 128>}, {pipeline_mode = #tpu.pipeline_mode<synchronous>, transform_indices = @transform_2, window_bounds = array<i64: 256, 256>}, {pipeline_mode = #tpu.pipeline_mode<synchronous>, transform_indices = @transform_3, window_bounds = array<i64: 128, 256>}, {pipeline_mode = #tpu.pipeline_mode<synchronous>, transform_indices = @transform_4, window_bounds = array<i64: 1, 256>}, {pipeline_mode = #tpu.pipeline_mode<synchronous>, transform_indices = @transform_5, window_bounds = array<i64: 256, 256>}, {pipeline_mode = #tpu.pipeline_mode<synchronous>, transform_indices = @transform_6, window_bounds = array<i64: 1, 256>}, {transform_indices = @transform_7, window_bounds = array<i64: 200, 256>}]} {
    %c0 = arith.constant 0 : index
    %c0_0 = arith.constant 0 : index
    %0 = vector.load %arg1[%c0, %c0_0] : memref<200x256xf32, #tpu.memory_space<vmem>>, vector<200x256xf32>
    %1 = arith.truncf %0 : vector<200x256xf32> to vector<200x256xbf16>
    %c0_1 = arith.constant 0 : index
    %c0_2 = arith.constant 0 : index
    %2 = vector.load %arg2[%c0_1, %c0_2] : memref<200x128xf32, #tpu.memory_space<vmem>>, vector<200x128xf32>
    %3 = arith.truncf %2 : vector<200x128xf32> to vector<200x128xbf16>
    %c0_3 = arith.constant 0 : index
    %c0_4 = arith.constant 0 : index
    %4 = vector.load %arg3[%c0_3, %c0_4] : memref<256x256xbf16, #tpu.memory_space<vmem>>, vector<256x256xbf16>
    %cst = arith.constant dense<0.000000e+00> : vector<200x256xf32>
    %5 = tpu.matmul %1, %4, %cst {dimension_numbers = #tpu.dot_dimension_numbers<[1], [0], [0], [1], [0, 0, 1, 1], [], []>} : vector<200x256xbf16>, vector<256x256xbf16>, vector<200x256xf32> -> vector<200x256xf32>
    %c0_5 = arith.constant 0 : index
    %c0_6 = arith.constant 0 : index
    %6 = vector.load %arg4[%c0_5, %c0_6] : memref<128x256xbf16, #tpu.memory_space<vmem>>, vector<128x256xbf16>
    %cst_7 = arith.constant dense<0.000000e+00> : vector<200x256xf32>
    %7 = tpu.matmul %3, %6, %cst_7 {dimension_numbers = #tpu.dot_dimension_numbers<[1], [0], [0], [1], [0, 0, 1, 1], [], []>} : vector<200x128xbf16>, vector<128x256xbf16>, vector<200x256xf32> -> vector<200x256xf32>
    %8 = arith.addf %5, %7 : vector<200x256xf32>
    %c0_8 = arith.constant 0 : index
    %c0_9 = arith.constant 0 : index
    %9 = vector.load %arg5[%c0_8, %c0_9] : memref<1x256xf32, #tpu.memory_space<vmem>>, vector<1x256xf32>
    %10 = vector.broadcast %9 : vector<1x256xf32> to vector<200x256xf32>
    %11 = arith.addf %8, %10 : vector<200x256xf32>
    %cst_10 = arith.constant 0.000000e+00 : f32
    %12 = vector.broadcast %cst_10 : f32 to vector<200x256xf32>
    %13 = arith.maximumf %11, %12 : vector<200x256xf32>
    %14 = arith.truncf %13 : vector<200x256xf32> to vector<200x256xbf16>
    %c0_11 = arith.constant 0 : index
    %c0_12 = arith.constant 0 : index
    %15 = vector.load %arg6[%c0_11, %c0_12] : memref<256x256xbf16, #tpu.memory_space<vmem>>, vector<256x256xbf16>
    %cst_13 = arith.constant dense<0.000000e+00> : vector<200x256xf32>
    %16 = tpu.matmul %14, %15, %cst_13 {dimension_numbers = #tpu.dot_dimension_numbers<[1], [0], [0], [1], [0, 0, 1, 1], [], []>} : vector<200x256xbf16>, vector<256x256xbf16>, vector<200x256xf32> -> vector<200x256xf32>
    %c0_14 = arith.constant 0 : index
    %c0_15 = arith.constant 0 : index
    %17 = vector.load %arg7[%c0_14, %c0_15] : memref<1x256xf32, #tpu.memory_space<vmem>>, vector<1x256xf32>
    %18 = vector.broadcast %17 : vector<1x256xf32> to vector<200x256xf32>
    %19 = arith.addf %16, %18 : vector<200x256xf32>
    %cst_16 = arith.constant 0.000000e+00 : f32
    %20 = vector.broadcast %cst_16 : f32 to vector<200x256xf32>
    %21 = arith.maximumf %19, %20 : vector<200x256xf32>
    %22 = arith.truncf %21 : vector<200x256xf32> to vector<200x256xbf16>
    %c0_17 = arith.constant 0 : index
    %c0_18 = arith.constant 0 : index
    %23 = vector.load %arg8[%c0_17, %c0_18] : memref<200x256xbf16, #tpu.memory_space<vmem>>, vector<200x256xbf16>
    tpu.vector_store %arg8[%c0_17, %c0_18], %22 {strides = array<i32>} : memref<200x256xbf16, #tpu.memory_space<vmem>>, vector<200x256xbf16>,
    return
  }
  func.func @transform_0(%arg0: i32) -> (i32, i32) {
    %c0_i32 = arith.constant 0 : i32
    %c0_i32_0 = arith.constant 0 : i32
    return %arg0, %c0_i32 : i32, i32
  }
  func.func @transform_1(%arg0: i32) -> (i32, i32) {
    %c0_i32 = arith.constant 0 : i32
    %c0_i32_0 = arith.constant 0 : i32
    return %arg0, %c0_i32 : i32, i32
  }
  func.func @transform_2(%arg0: i32) -> (i32, i32) {
    %c0_i32 = arith.constant 0 : i32
    %c0_i32_0 = arith.constant 0 : i32
    %c0_i32_1 = arith.constant 0 : i32
    return %c0_i32, %c0_i32_0 : i32, i32
  }
  func.func @transform_3(%arg0: i32) -> (i32, i32) {
    %c0_i32 = arith.constant 0 : i32
    %c0_i32_0 = arith.constant 0 : i32
    %c0_i32_1 = arith.constant 0 : i32
    return %c0_i32, %c0_i32_0 : i32, i32
  }
  func.func @transform_4(%arg0: i32) -> (i32, i32) {
    %c0_i32 = arith.constant 0 : i32
    %c0_i32_0 = arith.constant 0 : i32
    %c0_i32_1 = arith.constant 0 : i32
    return %c0_i32, %c0_i32_0 : i32, i32
  }
  func.func @transform_5(%arg0: i32) -> (i32, i32) {
    %c0_i32 = arith.constant 0 : i32
    %c0_i32_0 = arith.constant 0 : i32
    %c0_i32_1 = arith.constant 0 : i32
    return %c0_i32, %c0_i32_0 : i32, i32
  }
  func.func @transform_6(%arg0: i32) -> (i32, i32) {
    %c0_i32 = arith.constant 0 : i32
    %c0_i32_0 = arith.constant 0 : i32
    %c0_i32_1 = arith.constant 0 : i32
    return %c0_i32, %c0_i32_0 : i32, i32
  }
  func.func @transform_7(%arg0: i32) -> (i32, i32) {
    %c0_i32 = arith.constant 0 : i32
    %c0_i32_0 = arith.constant 0 : i32
    return %arg0, %c0_i32 : i32, i32
  }
}

</mosaic_0001>

<bundles_post_ra>
// kernel: roi_trans_head_forward.1
= control target key start
LH: loop header
LB: loop body
LE: loop exit
PB: predicated region body
PF: predicated region fallthrough
CT: control target
= control target key end

     0   :  { %s3328_s0 = inlined_call_operand.vmem [shape: f32[200,256], index: 0, kind: input, shape index: {}]   ;;  %s3329_s1 = inlined_call_operand.vmem [shape: f32[200,128], index: 1, kind: input, shape index: {}]   ;;  %s3330_s2 = inlined_call_operand.vmem [shape: bf16[256,256], index: 2, kind: input, shape index: {}]   ;;  %s3331_s3 = inlined_call_operand.vmem [shape: bf16[128,256], index: 3, kind: input, shape index: {}]   ;;  %s3332_s4 = inlined_call_operand.vmem [shape: f32[1,256], index: 4, kind: input, shape index: {}]   ;;  %s3333_s5 = inlined_call_operand.vmem [shape: bf16[256,256], index: 5, kind: input, shape index: {}]   ;;  %s3334_s6 = inlined_call_operand.vmem [shape: f32[1,256], index: 6, kind: input, shape index: {}]   ;;  %s3335_s7 = inlined_call_operand.hbm [shape: bf16[200,256], index: 7, kind: output, shape index: {}]  }
   0x1   :  { %v1665_v0 = vld [vmem:[%s3331_s3 + $0x70] sm:$0xf]  ;;  %v1974_v1 = vld [vmem:[%s3331_s3 + $0x74] sm:$0xf0]  ;;  %v1973_v2 = vld [vmem:[%s3331_s3 + $0x74] sm:$0xf] }
   0x2   :  { %v1666_v3 = vor.u32 %v1974_v1, %v1665_v0  ;;  %v1667_v4 = vld [vmem:[%s3331_s3 + $0x78] sm:$0xf0]  ;;  %v1657_v5 = vld [vmem:[%s3331_s3 + $0x60] sm:$0xf]  ;;  %v1972_v6 = vld [vmem:[%s3331_s3 + $0x64] sm:$0xf0] }
   0x3   :  { %v1670_v7 = vor.u32 %v1973_v2, %v1667_v4  ;;  %v1971_v8 = vld [vmem:[%s3331_s3 + $0x64] sm:$0xf]  ;;  %v1659_v9 = vld [vmem:[%s3331_s3 + $0x68] sm:$0xf0]  ;;  %v1658_v10 = vor.u32 %v1972_v6, %v1657_v5  ;;  %v1649_v12 = vld [vmem:[%s3331_s3 + $0x50] sm:$0xf] }
   0x4   :  { %269 = vmatpush.bf16.msra.mxu0 %v1666_v3  ;;  %2007 = vmatpush.bf16.msra.mxu2 %v1666_v3  ;;  %v1662_v11 = vor.u32 %v1971_v8, %v1659_v9  ;;  %v1970_v13 = vld [vmem:[%s3331_s3 + $0x54] sm:$0xf0]  ;;  %v1969_v14 = vld [vmem:[%s3331_s3 + $0x54] sm:$0xf]  ;;  %v1651_v15 = vld [vmem:[%s3331_s3 + $0x58] sm:$0xf0] }
   0x5   :  { %342 = vmatpush.bf16.msra.mxu1 %v1670_v7  ;;  %2015 = vmatpush.bf16.msra.mxu3 %v1670_v7  ;;  %v1650_v16 = vor.u32 %v1970_v13, %v1649_v12  ;;  %v1654_v17 = vor.u32 %v1969_v14, %v1651_v15  ;;  %v1641_v18 = vld [vmem:[%s3331_s3 + $0x40] sm:$0xf]  ;;  %v1968_v19 = vld [vmem:[%s3331_s3 + $0x44] sm:$0xf0]  ;;  %v1967_v20 = vld [vmem:[%s3331_s3 + $0x44] sm:$0xf] }
   0x6   :  { %v1643_v21 = vld [vmem:[%s3331_s3 + $0x48] sm:$0xf0]  ;;  %v1642_v22 = vor.u32 %v1968_v19, %v1641_v18  ;;  %v1633_v24 = vld [vmem:[%s3331_s3 + $0x30] sm:$0xf]  ;;  %v1966_v25 = vld [vmem:[%s3331_s3 + $0x34] sm:$0xf0] }
   0x7   :  { %v1646_v23 = vor.u32 %v1967_v20, %v1643_v21  ;;  %v1965_v26 = vld [vmem:[%s3331_s3 + $0x34] sm:$0xf]  ;;  %v1635_v27 = vld [vmem:[%s3331_s3 + $0x38] sm:$0xf0]  ;;  %v1634_v28 = vor.u32 %v1966_v25, %v1633_v24  ;;  %v1625_v30 = vld [vmem:[%s3331_s3 + $0x20] sm:$0xf] }
   0x8   :  { %270 = vmatpush.bf16.msra.mxu0 %v1658_v10  ;;  %2008 = vmatpush.bf16.msra.mxu2 %v1658_v10  ;;  %v1638_v29 = vor.u32 %v1965_v26, %v1635_v27  ;;  %v1964_v31 = vld [vmem:[%s3331_s3 + $0x24] sm:$0xf0] }
   0x9   :  { %343 = vmatpush.bf16.msra.mxu1 %v1662_v11  ;;  %2016 = vmatpush.bf16.msra.mxu3 %v1662_v11 }
   0xc   :  { %271 = vmatpush.bf16.msra.mxu0 %v1650_v16  ;;  %2009 = vmatpush.bf16.msra.mxu2 %v1650_v16 }
   0xd   :  { %344 = vmatpush.bf16.msra.mxu1 %v1654_v17  ;;  %2017 = vmatpush.bf16.msra.mxu3 %v1654_v17 }
  0x10   :  { %272 = vmatpush.bf16.msra.mxu0 %v1642_v22  ;;  %2010 = vmatpush.bf16.msra.mxu2 %v1642_v22 }
  0x11   :  { %345 = vmatpush.bf16.msra.mxu1 %v1646_v23  ;;  %2018 = vmatpush.bf16.msra.mxu3 %v1646_v23 }
  0x12   :  { %12 = vsyncpa [#allocation3], 0  ;;  %v1963_v32 = vld [vmem:[%s3331_s3 + $0x24] sm:$0xf]  ;;  %v1627_v33 = vld [vmem:[%s3331_s3 + $0x28] sm:$0xf0]  ;;  %v1626_v34 = vor.u32 %v1964_v31, %v1625_v30 }
  0x13   :  { %v1630_v35 = vor.u32 %v1963_v32, %v1627_v33  ;;  %v1617_v36 = vld [vmem:[%s3331_s3 + $0x10] sm:$0xf]  ;;  %v1962_v37 = vld [vmem:[%s3331_s3 + $0x14] sm:$0xf0]  ;;  %v1961_v38 = vld [vmem:[%s3331_s3 + $0x14] sm:$0xf] }
  0x14   :  { %273 = vmatpush.bf16.msra.mxu0 %v1634_v28  ;;  %2011 = vmatpush.bf16.msra.mxu2 %v1634_v28  ;;  %v1619_v39 = vld [vmem:[%s3331_s3 + $0x18] sm:$0xf0]  ;;  %v1618_v40 = vor.u32 %v1962_v37, %v1617_v36  ;;  %v1609_v42 = vld [vmem:[%s3331_s3] sm:$0xf]  ;;  %v1960_v43 = vld [vmem:[%s3331_s3 + $0x4] sm:$0xf0] }
  0x15   :  { %346 = vmatpush.bf16.msra.mxu1 %v1638_v29  ;;  %2019 = vmatpush.bf16.msra.mxu3 %v1638_v29  ;;  %v1622_v41 = vor.u32 %v1961_v38, %v1619_v39  ;;  %v1959_v44 = vld [vmem:[%s3331_s3 + $0x4] sm:$0xf]  ;;  %v1611_v45 = vld [vmem:[%s3331_s3 + $0x8] sm:$0xf0]  ;;  %v1941_v47 = vld [vmem:[%s3330_s2 + $0x74] sm:$0xf]  ;;  %v1610_v51 = vor.u32 %v1960_v43, %v1609_v42 }
  0x16   :  { %v103_v46 = vld [vmem:[%s3329_s1] sm:$0xff]  ;;  %v1731_v48 = vld [vmem:[%s3330_s2 + $0x78] sm:$0xf0]  ;;  %v1957_v49 = vld [vmem:[%s3330_s2 + $0xf4] sm:$0xf]  ;;  %v1614_v55 = vor.u32 %v1959_v44, %v1611_v45  ;;  %s2053_s27 = smov 128  }
  0x17   :  { %v1795_v50 = vld [vmem:[%s3330_s2 + $0xf8] sm:$0xf0]  ;;  %v104_v52 = vld [vmem:[%s3329_s1 + $0x8] sm:$0xff]  ;;  %v117_v53 = vld [vmem:[%s3329_s1 + $0x70] sm:$0xff]  ;;  %v1734_v58 = vor.u32 %v1941_v47, %v1731_v48  ;;  %s2054_s28 = smov 8  }
  0x18   :  { %274 = vmatpush.bf16.msra.mxu0 %v1626_v34  ;;  %2012 = vmatpush.bf16.msra.mxu2 %v1626_v34  ;;  %v118_v54 = vld [vmem:[%s3329_s1 + $0x78] sm:$0xff]  ;;  %v1729_v56 = vld [vmem:[%s3330_s2 + $0x70] sm:$0xf]  ;;  %v1798_v59 = vor.u32 %v1957_v49, %v1795_v50  ;;  %v1939_v62 = vld [vmem:[%s3330_s2 + $0x64] sm:$0xf]  ;;  %v128_v63 = vpack.c.bf16 %v104_v52, %v103_v46 }
  0x19   :  { %347 = vmatpush.bf16.msra.mxu1 %v1630_v35  ;;  %2020 = vmatpush.bf16.msra.mxu3 %v1630_v35  ;;  %v1942_v57 = vld [vmem:[%s3330_s2 + $0x74] sm:$0xf0]  ;;  %v1793_v60 = vld [vmem:[%s3330_s2 + $0xf0] sm:$0xf]  ;;  %v135_v0 = vpack.c.bf16 %v118_v54, %v117_v53  ;;  %v1723_v1 = vld [vmem:[%s3330_s2 + $0x68] sm:$0xf0] }
  0x1a   :  { %v1958_v61 = vld [vmem:[%s3330_s2 + $0xf4] sm:$0xf0]  ;;  %v1955_v2 = vld [vmem:[%s3330_s2 + $0xe4] sm:$0xf]  ;;  %v1787_v3 = vld [vmem:[%s3330_s2 + $0xe8] sm:$0xf0]  ;;  %v1730_v4 = vor.u32 %v1942_v57, %v1729_v56  ;;  %v1726_v8 = vor.u32 %v1939_v62, %v1723_v1 }
  0x1b   :  { %v1794_v5 = vor.u32 %v1958_v61, %v1793_v60  ;;  %v1721_v6 = vld [vmem:[%s3330_s2 + $0x60] sm:$0xf]  ;;  %v1940_v7 = vld [vmem:[%s3330_s2 + $0x64] sm:$0xf0]  ;;  %v1790_v9 = vor.u32 %v1955_v2, %v1787_v3  ;;  %v1937_v12 = vld [vmem:[%s3330_s2 + $0x54] sm:$0xf] }
  0x1c   :  { %275 = vmatpush.bf16.msra.mxu0 %v1618_v40  ;;  %2013 = vmatpush.bf16.msra.mxu2 %v1618_v40  ;;  %v1785_v10 = vld [vmem:[%s3330_s2 + $0xe0] sm:$0xf]  ;;  %v1956_v11 = vld [vmem:[%s3330_s2 + $0xe4] sm:$0xf0]  ;;  %v1715_v13 = vld [vmem:[%s3330_s2 + $0x58] sm:$0xf0]  ;;  %v1722_v16 = vor.u32 %v1940_v7, %v1721_v6 }
  0x1d   :  { %348 = vmatpush.bf16.msra.mxu1 %v1622_v41  ;;  %2021 = vmatpush.bf16.msra.mxu3 %v1622_v41  ;;  %v1953_v14 = vld [vmem:[%s3330_s2 + $0xd4] sm:$0xf]  ;;  %v1779_v15 = vld [vmem:[%s3330_s2 + $0xd8] sm:$0xf0]  ;;  %v1786_v17 = vor.u32 %v1956_v11, %v1785_v10  ;;  %v1713_v18 = vld [vmem:[%s3330_s2 + $0x50] sm:$0xf]  ;;  %v1718_v20 = vor.u32 %v1937_v12, %v1715_v13 }
  0x1e   :  { %v1938_v19 = vld [vmem:[%s3330_s2 + $0x54] sm:$0xf0]  ;;  %v1782_v21 = vor.u32 %v1953_v14, %v1779_v15  ;;  %v1777_v22 = vld [vmem:[%s3330_s2 + $0xd0] sm:$0xf]  ;;  %v1935_v24 = vld [vmem:[%s3330_s2 + $0x44] sm:$0xf] }
  0x1f   :  { %v1954_v23 = vld [vmem:[%s3330_s2 + $0xd4] sm:$0xf0]  ;;  %v1707_v25 = vld [vmem:[%s3330_s2 + $0x48] sm:$0xf0]  ;;  %v1951_v26 = vld [vmem:[%s3330_s2 + $0xc4] sm:$0xf]  ;;  %v1714_v28 = vor.u32 %v1938_v19, %v1713_v18 }
  0x20   :  { %276 = vmatpush.bf16.msra.mxu0 %v1610_v51  ;;  %2014 = vmatpush.bf16.msra.mxu2 %v1610_v51  ;;  %v1771_v27 = vld [vmem:[%s3330_s2 + $0xc8] sm:$0xf0]  ;;  %v1778_v29 = vor.u32 %v1954_v23, %v1777_v22  ;;  %v1710_v30 = vor.u32 %v1935_v24, %v1707_v25  ;;  %v1705_v32 = vld [vmem:[%s3330_s2 + $0x40] sm:$0xf]  ;;  %v1936_v33 = vld [vmem:[%s3330_s2 + $0x44] sm:$0xf0] }
  0x21   :  { %349 = vmatpush.bf16.msra.mxu1 %v1614_v55  ;;  %2022 = vmatpush.bf16.msra.mxu3 %v1614_v55  ;;  %v1774_v31 = vor.u32 %v1951_v26, %v1771_v27  ;;  %v105_v34 = vld [vmem:[%s3329_s1 + $0x10] sm:$0xff]  ;;  %v106_v35 = vld [vmem:[%s3329_s1 + $0x18] sm:$0xff]  ;;  %v119_v36 = vld [vmem:[%s3329_s1 + $0x80] sm:$0xff]  ;;  %v1706_v38 = vor.u32 %v1936_v33, %v1705_v32 }
  0x22   :  { %v120_v37 = vld [vmem:[%s3329_s1 + $0x88] sm:$0xff]  ;;  %v129_v39 = vpack.c.bf16 %v106_v35, %v105_v34  ;;  %v1769_v41 = vld [vmem:[%s3330_s2 + $0xc0] sm:$0xf]  ;;  %v1933_v43 = vld [vmem:[%s3330_s2 + $0x34] sm:$0xf] }
  0x23   :  { %277 = vmatmul.bf16.vlgmr.msra.gmra.mxu0 %v128_v63  ;;  %312 = vmatmul.bf16.vlgmr.msra.gmra.mxu2 %v135_v0  ;;  %v136_v40 = vpack.c.bf16 %v120_v37, %v119_v36  ;;  %v1952_v42 = vld [vmem:[%s3330_s2 + $0xc4] sm:$0xf0]  ;;  %v1699_v45 = vld [vmem:[%s3330_s2 + $0x38] sm:$0xf0]  ;;  %v1697_v46 = vld [vmem:[%s3330_s2 + $0x30] sm:$0xf] }
  0x24   :  { %721 = vmatpush.bf16.msrb.mxu0 %v1734_v58  ;;  %350 = vmatmul.bf16.vlgmr.msra.gmra.mxu1 %v128_v63  ;;  %v1770_v44 = vor.u32 %v1952_v42, %v1769_v41  ;;  %v1934_v47 = vld [vmem:[%s3330_s2 + $0x34] sm:$0xf0]  ;;  %v1702_v48 = vor.u32 %v1933_v43, %v1699_v45  ;;  %v1949_v50 = vld [vmem:[%s3330_s2 + $0xb4] sm:$0xf]  ;;  %v1763_v51 = vld [vmem:[%s3330_s2 + $0xb8] sm:$0xf0] }
  0x25   :  { %794 = vmatpush.bf16.msrb.mxu1 %v1798_v59  ;;  %385 = vmatmul.bf16.vlgmr.msra.gmra.mxu3 %v135_v0  ;;  %v1698_v49 = vor.u32 %v1934_v47, %v1697_v46  ;;  %v1761_v52 = vld [vmem:[%s3330_s2 + $0xb0] sm:$0xf]  ;;  %v1766_v53 = vor.u32 %v1949_v50, %v1763_v51  ;;  %v1950_v54 = vld [vmem:[%s3330_s2 + $0xb4] sm:$0xf0]  ;;  %v107_v56 = vld [vmem:[%s3329_s1 + $0x20] sm:$0xff] }
  0x26   :  { %575 = vmatpush.bf16.msrb.mxu2 %v1730_v4  ;;  %648 = vmatpush.bf16.msrb.mxu3 %v1794_v5  ;;  %v1762_v55 = vor.u32 %v1950_v54, %v1761_v52  ;;  %v108_v57 = vld [vmem:[%s3329_s1 + $0x28] sm:$0xff]  ;;  %v121_v58 = vld [vmem:[%s3329_s1 + $0x90] sm:$0xff]  ;;  %v122_v59 = vld [vmem:[%s3329_s1 + $0x98] sm:$0xff] }
  0x27   :  { %v130_v60 = vpack.c.bf16 %v108_v57, %v107_v56  ;;  %v137_v61 = vpack.c.bf16 %v122_v59, %v121_v58  ;;  %v1689_v62 = vld [vmem:[%s3330_s2 + $0x20] sm:$0xf]  ;;  %v1932_v63 = vld [vmem:[%s3330_s2 + $0x24] sm:$0xf0]  ;;  %v1931_v0 = vld [vmem:[%s3330_s2 + $0x24] sm:$0xf] }
  0x28   :  { %722 = vmatpush.bf16.msrb.mxu0 %v1726_v8  ;;  %v1690_v1 = vor.u32 %v1932_v63, %v1689_v62  ;;  %v1691_v2 = vld [vmem:[%s3330_s2 + $0x28] sm:$0xf0]  ;;  %v1753_v3 = vld [vmem:[%s3330_s2 + $0xa0] sm:$0xf]  ;;  %v1948_v4 = vld [vmem:[%s3330_s2 + $0xa4] sm:$0xf0] }
  0x29   :  { %795 = vmatpush.bf16.msrb.mxu1 %v1790_v9  ;;  %v1694_v5 = vor.u32 %v1931_v0, %v1691_v2  ;;  %v1754_v6 = vor.u32 %v1948_v4, %v1753_v3  ;;  %v1947_v7 = vld [vmem:[%s3330_s2 + $0xa4] sm:$0xf]  ;;  %v1755_v8 = vld [vmem:[%s3330_s2 + $0xa8] sm:$0xf0]  ;;  %v109_v10 = vld [vmem:[%s3329_s1 + $0x30] sm:$0xff] }
  0x2a   :  { %576 = vmatpush.bf16.msrb.mxu2 %v1722_v16  ;;  %649 = vmatpush.bf16.msrb.mxu3 %v1786_v17  ;;  %v1758_v9 = vor.u32 %v1947_v7, %v1755_v8  ;;  %v110_v11 = vld [vmem:[%s3329_s1 + $0x38] sm:$0xff]  ;;  %v123_v12 = vld [vmem:[%s3329_s1 + $0xa0] sm:$0xff]  ;;  %v124_v13 = vld [vmem:[%s3329_s1 + $0xa8] sm:$0xff] }
  0x2b   :  { %v131_v14 = vpack.c.bf16 %v110_v11, %v109_v10  ;;  %v138_v15 = vpack.c.bf16 %v124_v13, %v123_v12  ;;  %v1681_v16 = vld [vmem:[%s3330_s2 + $0x10] sm:$0xf]  ;;  %v1930_v17 = vld [vmem:[%s3330_s2 + $0x14] sm:$0xf0]  ;;  %v1683_v22 = vld [vmem:[%s3330_s2 + $0x18] sm:$0xf0] }
  0x2c   :  { %723 = vmatpush.bf16.msrb.mxu0 %v1718_v20  ;;  %v1745_v18 = vld [vmem:[%s3330_s2 + $0x90] sm:$0xf]  ;;  %v1682_v19 = vor.u32 %v1930_v17, %v1681_v16  ;;  %v1946_v20 = vld [vmem:[%s3330_s2 + $0x94] sm:$0xf0]  ;;  %v1945_v25 = vld [vmem:[%s3330_s2 + $0x94] sm:$0xf] }
  0x2d   :  { %796 = vmatpush.bf16.msrb.mxu1 %v1782_v21  ;;  %v1929_v21 = vld [vmem:[%s3330_s2 + $0x14] sm:$0xf]  ;;  %v1746_v23 = vor.u32 %v1946_v20, %v1745_v18  ;;  %v1747_v26 = vld [vmem:[%s3330_s2 + $0x98] sm:$0xf0]  ;;  %v1673_v27 = vld [vmem:[%s3330_s2] sm:$0xf] }
  0x2e   :  { %577 = vmatpush.bf16.msrb.mxu2 %v1714_v28  ;;  %650 = vmatpush.bf16.msrb.mxu3 %v1778_v29  ;;  %v1686_v24 = vor.u32 %v1929_v21, %v1683_v22  ;;  %v1750_v28 = vor.u32 %v1945_v25, %v1747_v26  ;;  %v1928_v29 = vld [vmem:[%s3330_s2 + $0x4] sm:$0xf0]  ;;  %v111_v34 = vld [vmem:[%s3329_s1 + $0x40] sm:$0xff]  ;;  %v125_v36 = vld [vmem:[%s3329_s1 + $0xb0] sm:$0xff] }
  0x2f   :  { %v1674_v32 = vor.u32 %v1928_v29, %v1673_v27  ;;  %v112_v35 = vld [vmem:[%s3329_s1 + $0x48] sm:$0xff]  ;;  %v126_v37 = vld [vmem:[%s3329_s1 + $0xb8] sm:$0xff]  ;;  %v1943_v42 = vld [vmem:[%s3330_s2 + $0x84] sm:$0xf] }
  0x30   :  { %724 = vmatpush.bf16.msrb.mxu0 %v1710_v30  ;;  %v1737_v30 = vld [vmem:[%s3330_s2 + $0x80] sm:$0xf]  ;;  %v1675_v41 = vld [vmem:[%s3330_s2 + $0x8] sm:$0xf0]  ;;  %v1857_v45 = vld [vmem:[%s3333_s5 + $0x70] sm:$0xf] }
  0x31   :  { %797 = vmatpush.bf16.msrb.mxu1 %v1774_v31  ;;  %v1944_v31 = vld [vmem:[%s3330_s2 + $0x84] sm:$0xf0]  ;;  %v1990_v46 = vld [vmem:[%s3333_s5 + $0x74] sm:$0xf0]  ;;  %v113_v52 = vld [vmem:[%s3329_s1 + $0x50] sm:$0xff] }
  0x32   :  { %578 = vmatpush.bf16.msrb.mxu2 %v1706_v38  ;;  %651 = vmatpush.bf16.msrb.mxu3 %v1770_v44  ;;  %v1738_v33 = vor.u32 %v1944_v31, %v1737_v30  ;;  %v132_v38 = vpack.c.bf16 %v112_v35, %v111_v34  ;;  %v1739_v44 = vld [vmem:[%s3330_s2 + $0x88] sm:$0xf0]  ;;  %v2006_v50 = vld [vmem:[%s3333_s5 + $0xf4] sm:$0xf0]  ;;  %v127_v54 = vld [vmem:[%s3329_s1 + $0xc0] sm:$0xff] }
  0x33   :  { %282 = vmatmul.bf16.gmra.mxu0 %v129_v39  ;;  %317 = vmatmul.bf16.gmra.mxu2 %v136_v40  ;;  %v1742_v47 = vor.u32 %v1943_v42, %v1739_v44  ;;  %v140_v56 = vpack.c.bf16 %v127_v54, %v127_v54  ;;  %v1989_v57 = vld [vmem:[%s3333_s5 + $0x74] sm:$0xf]  ;;  %v1859_v58 = vld [vmem:[%s3333_s5 + $0x78] sm:$0xf0]  ;;  %v115_v63 = vld [vmem:[%s3329_s1 + $0x60] sm:$0xff] }
  0x34   :  { %355 = vmatmul.bf16.gmra.mxu1 %v129_v39  ;;  %725 = vmatpush.bf16.msrb.mxu0 %v1702_v48  ;;  %v139_v39 = vpack.c.bf16 %v126_v37, %v125_v36  ;;  %v1858_v48 = vor.u32 %v1990_v46, %v1857_v45  ;;  %v2005_v59 = vld [vmem:[%s3333_s5 + $0xf4] sm:$0xf]  ;;  %v116_v0 = vld [vmem:[%s3329_s1 + $0x68] sm:$0xff]  ;;  %v30_v4 = vld [vmem:[%s3328_s0 + $0x18] sm:$0xff] }
  0x35   :  { %390 = vmatmul.bf16.gmra.mxu3 %v136_v40  ;;  %798 = vmatpush.bf16.msrb.mxu1 %v1766_v53  ;;  %v1927_v40 = vld [vmem:[%s3330_s2 + $0x4] sm:$0xf]  ;;  %v114_v53 = vld [vmem:[%s3329_s1 + $0x58] sm:$0xff]  ;;  %v29_v2 = vld [vmem:[%s3328_s0 + $0x10] sm:$0xff]  ;;  %s1595_s1 = sshll.u32 %s3335_s7, 4  ;;  %s1596_s1 = int_to_ptr.hbm [resolvable:$true] %s1595_s1 }
  0x36   :  { %579 = vmatpush.bf16.msrb.mxu2 %v1698_v49  ;;  %652 = vmatpush.bf16.msrb.mxu3 %v1762_v55  ;;  %v1678_v43 = vor.u32 %v1927_v40, %v1675_v41  ;;  %v1921_v49 = vld [vmem:[%s3333_s5 + $0xf0] sm:$0xf]  ;;  %v133_v55 = vpack.c.bf16 %v114_v53, %v113_v52  ;;  %v28_v3 = vld [vmem:[%s3328_s0 + $0x8] sm:$0xff]  ;;  %v1849_v8 = vld [vmem:[%s3333_s5 + $0x60] sm:$0xf] }
  0x37   :  { %v1922_v51 = vor.u32 %v2006_v50, %v1921_v49  ;;  %v78_v7 = vpack.c.bf16 %v30_v4, %v28_v3  ;;  %v1913_v11 = vld [vmem:[%s3333_s5 + $0xe0] sm:$0xf]  ;;  %v2004_v12 = vld [vmem:[%s3333_s5 + $0xe4] sm:$0xf0]  ;;  %v1987_v13 = vld [vmem:[%s3333_s5 + $0x64] sm:$0xf] }
  0x38   :  { %726 = vmatpush.bf16.msrb.mxu0 %v1694_v5  ;;  %v134_v5 = vpack.c.bf16 %v116_v0, %v115_v63  ;;  %v31_v17 = vld [vmem:[%s3328_s0 + $0x20] sm:$0xff]  ;;  %v33_v18 = vld [vmem:[%s3328_s0 + $0x30] sm:$0xff]  ;;  %v34_v20 = vld [vmem:[%s3328_s0 + $0x38] sm:$0xff] }
  0x39   :  { %799 = vmatpush.bf16.msrb.mxu1 %v1758_v9  ;;  %v1988_v9 = vld [vmem:[%s3333_s5 + $0x64] sm:$0xf0]  ;;  %v79_v21 = vpack.c.bf16 %v33_v18, %v31_v17  ;;  %v2003_v22 = vld [vmem:[%s3333_s5 + $0xe4] sm:$0xf]  ;;  %v37_v27 = vld [vmem:[%s3328_s0 + $0x50] sm:$0xff] }
  0x3a   :  { %580 = vmatpush.bf16.msrb.mxu2 %v1690_v1  ;;  %653 = vmatpush.bf16.msrb.mxu3 %v1754_v6  ;;  %v27_v1 = vld [vmem:[%s3328_s0] sm:$0xff]  ;;  %v1850_v10 = vor.u32 %v1988_v9, %v1849_v8  ;;  %v38_v29 = vld [vmem:[%s3328_s0 + $0x58] sm:$0xff]  ;;  %v1841_v34 = vld [vmem:[%s3333_s5 + $0x50] sm:$0xf] }
  0x3b   :  { %v77_v6 = vpack.c.bf16 %v29_v2, %v27_v1  ;;  %v35_v26 = vld [vmem:[%s3328_s0 + $0x40] sm:$0xff]  ;;  %v1986_v35 = vld [vmem:[%s3333_s5 + $0x54] sm:$0xf0]  ;;  %v1905_v37 = vld [vmem:[%s3333_s5 + $0xd0] sm:$0xf] }
  0x3c   :  { %727 = vmatpush.bf16.msrb.mxu0 %v1686_v24  ;;  %v81_v30 = vpack.c.bf16 %v37_v27, %v35_v26  ;;  %v1842_v36 = vor.u32 %v1986_v35, %v1841_v34  ;;  %v1985_v42 = vld [vmem:[%s3333_s5 + $0x54] sm:$0xf]  ;;  %v39_v50 = vld [vmem:[%s3328_s0 + $0x60] sm:$0xff]  ;;  %v40_v52 = vld [vmem:[%s3328_s0 + $0x68] sm:$0xff] }
  0x3d   :  { %800 = vmatpush.bf16.msrb.mxu1 %v1750_v28  ;;  %v36_v28 = vld [vmem:[%s3328_s0 + $0x48] sm:$0xff]  ;;  %v42_v53 = vld [vmem:[%s3328_s0 + $0x78] sm:$0xff]  ;;  %v1833_v0 = vld [vmem:[%s3333_s5 + $0x40] sm:$0xf] }
  0x3e   :  { %581 = vmatpush.bf16.msrb.mxu2 %v1682_v19  ;;  %654 = vmatpush.bf16.msrb.mxu3 %v1746_v23  ;;  %v32_v19 = vld [vmem:[%s3328_s0 + $0x28] sm:$0xff]  ;;  %v1897_v2 = vld [vmem:[%s3333_s5 + $0xc0] sm:$0xf]  ;;  %v46_v9 = vld [vmem:[%s3328_s0 + $0x98] sm:$0xff] }
  0x3f   :  { %v1915_v23 = vld [vmem:[%s3333_s5 + $0xe8] sm:$0xf0]  ;;  %v80_v24 = vpack.c.bf16 %v34_v20, %v32_v19  ;;  %v1984_v1 = vld [vmem:[%s3333_s5 + $0x44] sm:$0xf0]  ;;  %v1999_v19 = vld [vmem:[%s3333_s5 + $0xc4] sm:$0xf] }
  0x40   :  { %728 = vmatpush.bf16.msrb.mxu0 %v1678_v43  ;;  %v1918_v25 = vor.u32 %v2003_v22, %v1915_v23  ;;  %v1843_v43 = vld [vmem:[%s3333_s5 + $0x58] sm:$0xf0]  ;;  %v1834_v3 = vor.u32 %v1984_v1, %v1833_v0  ;;  %v2000_v4 = vld [vmem:[%s3333_s5 + $0xc4] sm:$0xf0]  ;;  %v1835_v17 = vld [vmem:[%s3333_s5 + $0x48] sm:$0xf0] }
  0x41   :  { %801 = vmatpush.bf16.msrb.mxu1 %v1742_v47  ;;  %v1846_v45 = vor.u32 %v1985_v42, %v1843_v43  ;;  %v2001_v47 = vld [vmem:[%s3333_s5 + $0xd4] sm:$0xf]  ;;  %v44_v8 = vld [vmem:[%s3328_s0 + $0x88] sm:$0xff]  ;;  %v47_v26 = vld [vmem:[%s3328_s0 + $0xa0] sm:$0xff] }
  0x42   :  { %582 = vmatpush.bf16.msrb.mxu2 %v1674_v32  ;;  %655 = vmatpush.bf16.msrb.mxu3 %v1738_v33  ;;  %v82_v32 = vpack.c.bf16 %v38_v29, %v36_v28  ;;  %v1899_v20 = vld [vmem:[%s3333_s5 + $0xc8] sm:$0xf0]  ;;  %v49_v27 = vld [vmem:[%s3328_s0 + $0xb0] sm:$0xff]  ;;  %v50_v29 = vld [vmem:[%s3328_s0 + $0xb8] sm:$0xff] }
  0x43   :  { %287 = vmatmul.bf16.gmra.mxu0 %v130_v60  ;;  %322 = vmatmul.bf16.gmra.mxu2 %v137_v61  ;;  %v48_v28 = vld [vmem:[%s3328_s0 + $0xa8] sm:$0xff]  ;;  %v87_v34 = vpack.c.bf16 %v49_v27, %v47_v26  ;;  %v1891_v0 = vld [vmem:[%s3333_s5 + $0xb8] sm:$0xf0] }
  0x44   :  { %360 = vmatmul.bf16.gmra.mxu1 %v130_v60  ;;  %v1862_v60 = vor.u32 %v1989_v57, %v1859_v58  ;;  %v84_v58 = vpack.c.bf16 %v42_v53, %v40_v52  ;;  %v1981_v52 = vld [vmem:[%s3333_s5 + $0x34] sm:$0xf]  ;;  %v1827_v53 = vld [vmem:[%s3333_s5 + $0x38] sm:$0xf0]  ;;  %v56_v26 = vld [vmem:[%s3328_s0 + $0xe8] sm:$0xff] }
  0x45   :  { %395 = vmatmul.bf16.gmra.mxu3 %v137_v61  ;;  %v1923_v61 = vld [vmem:[%s3333_s5 + $0xf8] sm:$0xf0] }
  0x46   :  { %1197 = vmatpush.bf16.msra.mxu2 %v1858_v48  ;;  %1270 = vmatpush.bf16.msra.mxu3 %v1922_v51  ;;  %v1926_v62 = vor.u32 %v2005_v59, %v1923_v61  ;;  %v1907_v48 = vld [vmem:[%s3333_s5 + $0xd8] sm:$0xf0]  ;;  %v41_v51 = vld [vmem:[%s3328_s0 + $0x70] sm:$0xff] }
  0x47   :  { %1343 = vmatpush.bf16.msra.mxu0 %v1862_v60  ;;  %v1910_v49 = vor.u32 %v2001_v47, %v1907_v48  ;;  %v1889_v47 = vld [vmem:[%s3333_s5 + $0xb0] sm:$0xf]  ;;  %v1998_v48 = vld [vmem:[%s3333_s5 + $0xb4] sm:$0xf0] }
  0x48   :  { %1416 = vmatpush.bf16.msra.mxu1 %v1926_v62  ;;  %v58_v27 = vld [vmem:[%s3328_s0 + $0xf8] sm:$0xff] }
  0x4a   :  { %1198 = vmatpush.bf16.msra.mxu2 %v1850_v10 }
  0x4c   :  { %1417 = vmatpush.bf16.msra.mxu1 %v1918_v25 }
  0x4e   :  { %1199 = vmatpush.bf16.msra.mxu2 %v1842_v36  ;;  %v88_v36 = vpack.c.bf16 %v50_v29, %v48_v28 }
  0x50   :  { %1418 = vmatpush.bf16.msra.mxu1 %v1910_v49 }
  0x52   :  { %1200 = vmatpush.bf16.msra.mxu2 %v1834_v3  ;;  %v53_v3 = vld [vmem:[%s3328_s0 + $0xd0] sm:$0xff] }
  0x53   :  { %292 = vmatmul.bf16.gmra.mxu0 %v131_v14  ;;  %327 = vmatmul.bf16.gmra.mxu2 %v138_v15 }
  0x54   :  { %365 = vmatmul.bf16.gmra.mxu1 %v131_v14  ;;  %v1914_v14 = vor.u32 %v2004_v12, %v1913_v11 }
  0x55   :  { %400 = vmatmul.bf16.gmra.mxu3 %v138_v15  ;;  %v1851_v15 = vld [vmem:[%s3333_s5 + $0x68] sm:$0xf0] }
  0x56   :  { %v1854_v16 = vor.u32 %v1987_v13, %v1851_v15  ;;  %1271 = vmatpush.bf16.msra.mxu3 %v1914_v14  ;;  %v86_v14 = vpack.c.bf16 %v46_v9, %v44_v8 }
  0x58   :  { %1344 = vmatpush.bf16.msra.mxu0 %v1854_v16  ;;  %v1983_v16 = vld [vmem:[%s3333_s5 + $0x44] sm:$0xf] }
  0x59   :  { %v1838_v18 = vor.u32 %v1983_v16, %v1835_v17 }
  0x5c   :  { %1345 = vmatpush.bf16.msra.mxu0 %v1846_v45 }
  0x60   :  { %1346 = vmatpush.bf16.msra.mxu0 %v1838_v18 }
  0x63   :  { %297 = vmatmul.bf16.gmra.mxu0 %v132_v38  ;;  %332 = vmatmul.bf16.gmra.mxu2 %v139_v39 }
  0x64   :  { %370 = vmatmul.bf16.gmra.mxu1 %v132_v38  ;;  %v2002_v38 = vld [vmem:[%s3333_s5 + $0xd4] sm:$0xf0] }
  0x65   :  { %405 = vmatmul.bf16.gmra.mxu3 %v139_v39  ;;  %v1906_v39 = vor.u32 %v2002_v38, %v1905_v37  ;;  %v1825_v38 = vld [vmem:[%s3333_s5 + $0x30] sm:$0xf] }
  0x67   :  { %1272 = vmatpush.bf16.msra.mxu3 %v1906_v39  ;;  %v1982_v39 = vld [vmem:[%s3333_s5 + $0x34] sm:$0xf0] }
  0x68   :  { %v1826_v42 = vor.u32 %v1982_v39, %v1825_v38  ;;  %v92_v38 = vpack.c.bf16 %v58_v27, %v56_v26  ;;  %v1883_v26 = vld [vmem:[%s3333_s5 + $0xa8] sm:$0xf0] }
  0x6a   :  { %1201 = vmatpush.bf16.msra.mxu2 %v1826_v42 }
  0x73   :  { %302 = vmatmul.bf16.gmra.mxu0 %v133_v55  ;;  %337 = vmatmul.bf16.gmra.mxu2 %v140_v56 }
  0x74   :  { %375 = vmatmul.bf16.gmra.mxu1 %v133_v55 }
  0x75   :  { %410 = vmatmul.bf16.gmra.mxu3 %v140_v56  ;;  %v83_v56 = vpack.c.bf16 %v41_v51, %v39_v50  ;;  %v1890_v50 = vor.u32 %v1998_v48, %v1889_v47  ;;  %v1817_v48 = vld [vmem:[%s3333_s5 + $0x20] sm:$0xf] }
  0x83   :  { %307 = vmatmul.bf16.gmra.mxu0 %v134_v5  ;;  %583 = vmatmul.bf16.vlgmr.msrb.gmra.mxu2 %v77_v6 }
  0x84   :  { %380 = vmatmul.bf16.gmra.mxu1 %v134_v5  ;;  %v1898_v5 = vor.u32 %v2000_v4, %v1897_v2  ;;  %v51_v2 = vld [vmem:[%s3328_s0 + $0xc0] sm:$0xff]  ;;  %v52_v4 = vld [vmem:[%s3328_s0 + $0xc8] sm:$0xff] }
  0x85   :  { %656 = vmatmul.bf16.vlgmr.msrb.gmra.mxu3 %v78_v7  ;;  %v89_v8 = vpack.c.bf16 %v53_v3, %v51_v2 }
  0x86   :  { %1273 = vmatpush.bf16.msra.mxu3 %v1898_v5  ;;  %v54_v5 = vld [vmem:[%s3328_s0 + $0xd8] sm:$0xff] }
  0x8a   :  { %1274 = vmatpush.bf16.msra.mxu3 %v1890_v50  ;;  %v1980_v50 = vld [vmem:[%s3333_s5 + $0x24] sm:$0xf0] }
  0x93   :  { %588 = vmatmul.bf16.gmra.mxu2 %v79_v21  ;;  %729 = vmatmul.bf16.vlgmr.msrb.gmra.mxu0 %v77_v6  ;;  %v43_v6 = vld [vmem:[%s3328_s0 + $0x80] sm:$0xff] }
  0x94   :  { %802 = vmatmul.bf16.vlgmr.msrb.gmra.mxu1 %v78_v7  ;;  %v45_v7 = vld [vmem:[%s3328_s0 + $0x90] sm:$0xff] }
  0x95   :  { %661 = vmatmul.bf16.gmra.mxu3 %v80_v24  ;;  %v85_v12 = vpack.c.bf16 %v45_v7, %v43_v6 }
  0xa0   :  { %v2542_v31 = vpop.f32.mrf.mxu0 }
  0xa1   :  { %v2544_v33 = vpop.f32.mrf.mxu1 }
  0xa3   :  { %593 = vmatmul.bf16.gmra.mxu2 %v81_v30  ;;  %734 = vmatmul.bf16.gmra.mxu0 %v79_v21  ;;  %v1902_v21 = vor.u32 %v1999_v19, %v1899_v20  ;;  %v55_v20 = vld [vmem:[%s3328_s0 + $0xe0] sm:$0xff] }
  0xa4   :  { %807 = vmatmul.bf16.gmra.mxu1 %v80_v24 }
  0xa5   :  { %666 = vmatmul.bf16.gmra.mxu3 %v82_v32  ;;  %1419 = vmatpush.bf16.msra.mxu1 %v1902_v21  ;;  %v57_v21 = vld [vmem:[%s3328_s0 + $0xf0] sm:$0xff] }
  0xa6   :  { %v2558_v40 = vpop.f32.mrf.mxu2 }
  0xa8   :  { %v2560_v41 = vpop.f32.mrf.mxu3  ;;  %v2568_v44 = vpop.f32.mrf.mxu0 }
  0xa9   :  { %3336 = vst [vmem:[#allocation5_spill] sm:$0xff] %v2560_v41  ;;  %v2570_v46 = vpop.f32.mrf.mxu1 }
  0xae   :  { %v2590_v54 = vpop.f32.mrf.mxu2 }
  0xaf   :  { %3337 = vst [vmem:[#allocation6_spill] sm:$0xff] %v2590_v54 }
  0xb0   :  { %v2592_v55 = vpop.f32.mrf.mxu3  ;;  %v2594_v57 = vpop.f32.mrf.mxu0 }
  0xb1   :  { %3338 = vst [vmem:[#allocation7_spill] sm:$0xff] %v2592_v55  ;;  %v2596_v59 = vpop.f32.mrf.mxu1  ;;  %v867_v55 = vld [vmem:[%s3332_s4] sm:$0x3] }
  0xb2   :  { %v2967_v54 = vperm.slane %v867_v55, 0 }
  0xb3   :  { %598 = vmatmul.bf16.gmra.mxu2 %v83_v56  ;;  %739 = vmatmul.bf16.gmra.mxu0 %v81_v30 }
  0xb4   :  { %812 = vmatmul.bf16.gmra.mxu1 %v82_v32 }
  0xb5   :  { %671 = vmatmul.bf16.gmra.mxu3 %v84_v58 }
  0xb6   :  { %v2598_v60 = vpop.f32.mrf.mxu2 }
  0xb8   :  { %v2600_v61 = vpop.f32.mrf.mxu3  ;;  %v2602_v62 = vpop.f32.mrf.mxu0 }
  0xb9   :  { %3339 = vst [vmem:[#allocation8_spill] sm:$0xff] %v2600_v61  ;;  %v2604_v63 = vpop.f32.mrf.mxu1 }
  0xbe   :  { %v2630_v10 = vpop.f32.mrf.mxu2 }
  0xbf   :  { %3340 = vst [vmem:[#allocation9_spill] sm:$0xff] %v2630_v10 }
  0xc0   :  { %v2632_v11 = vpop.f32.mrf.mxu3  ;;  %v2634_v13 = vpop.f32.mrf.mxu0 }
  0xc1   :  { %3341 = vst [vmem:[#allocation10_spill] sm:$0xff] %v2632_v11  ;;  %v2636_v15 = vpop.f32.mrf.mxu1  ;;  %v1991_v11 = vld [vmem:[%s3333_s5 + $0x84] sm:$0xf] }
  0xc3   :  { %603 = vmatmul.bf16.gmra.mxu2 %v85_v12  ;;  %744 = vmatmul.bf16.gmra.mxu0 %v83_v56  ;;  %v1997_v56 = vld [vmem:[%s3333_s5 + $0xb4] sm:$0xf] }
  0xc4   :  { %817 = vmatmul.bf16.gmra.mxu1 %v84_v58  ;;  %v1830_v58 = vor.u32 %v1981_v52, %v1827_v53  ;;  %v1894_v1 = vor.u32 %v1997_v56, %v1891_v0  ;;  %v1881_v52 = vld [vmem:[%s3333_s5 + $0xa0] sm:$0xf]  ;;  %v1818_v56 = vor.u32 %v1980_v50, %v1817_v48  ;;  %v1979_v0 = vld [vmem:[%s3333_s5 + $0x24] sm:$0xf] }
  0xc5   :  { %676 = vmatmul.bf16.gmra.mxu3 %v86_v14 }
  0xc6   :  { %v2650_v22 = vpop.f32.mrf.mxu2  ;;  %1347 = vmatpush.bf16.msra.mxu0 %v1830_v58  ;;  %1420 = vmatpush.bf16.msra.mxu1 %v1894_v1  ;;  %v1996_v58 = vld [vmem:[%s3333_s5 + $0xa4] sm:$0xf0]  ;;  %v1819_v1 = vld [vmem:[%s3333_s5 + $0x28] sm:$0xf0] }
  0xc7   :  { %v1882_v3 = vor.u32 %v1996_v58, %v1881_v52  ;;  %1202 = vmatpush.bf16.msra.mxu2 %v1818_v56 }
  0xc8   :  { %v2652_v23 = vpop.f32.mrf.mxu3  ;;  %v2654_v24 = vpop.f32.mrf.mxu0 }
  0xc9   :  { %3342 = vst [vmem:[#allocation11_spill] sm:$0xff] %v2652_v23  ;;  %v2656_v25 = vpop.f32.mrf.mxu1  ;;  %1275 = vmatpush.bf16.msra.mxu3 %v1882_v3  ;;  %v1801_v23 = vld [vmem:[%s3333_s5] sm:$0xf] }
  0xce   :  { %v2670_v30 = vpop.f32.mrf.mxu2 }
  0xcf   :  { %3343 = vst [vmem:[#allocation12_spill] sm:$0xff] %v2670_v30 }
  0xd0   :  { %v2672_v32 = vpop.f32.mrf.mxu3  ;;  %v2674_v35 = vpop.f32.mrf.mxu0 }
  0xd1   :  { %3344 = vst [vmem:[#allocation13_spill] sm:$0xff] %v2672_v32  ;;  %v2676_v37 = vpop.f32.mrf.mxu1  ;;  %v71_v32 = vld [vmem:[%s3328_s0 + $0x160] sm:$0xff] }
  0xd3   :  { %608 = vmatmul.bf16.gmra.mxu2 %v87_v34  ;;  %749 = vmatmul.bf16.gmra.mxu0 %v85_v12  ;;  %v90_v12 = vpack.c.bf16 %v54_v5, %v52_v4  ;;  %v1822_v4 = vor.u32 %v1979_v0, %v1819_v1  ;;  %v59_v5 = vld [vmem:[%s3328_s0 + $0x100] sm:$0xff] }
  0xd4   :  { %822 = vmatmul.bf16.gmra.mxu1 %v86_v14 }
  0xd5   :  { %681 = vmatmul.bf16.gmra.mxu3 %v88_v36  ;;  %1348 = vmatpush.bf16.msra.mxu0 %v1822_v4 }
  0xd6   :  { %v2684_v43 = vpop.f32.mrf.mxu2 }
  0xd7   :  { %3345 = vst [vmem:[#allocation14_spill] sm:$0xff] %v2684_v43  ;;  %v2971_v43 = vperm.slane %v867_v55, 1 }
  0xd8   :  { %v2686_v45 = vpop.f32.mrf.mxu3  ;;  %v2694_v49 = vpop.f32.mrf.mxu0 }
  0xd9   :  { %3346 = vst [vmem:[#allocation15_spill] sm:$0xff] %v2686_v45  ;;  %v2696_v51 = vpop.f32.mrf.mxu1 }
  0xde   :  { %v2722_v6 = vpop.f32.mrf.mxu2 }
  0xdf   :  { %3347 = vst [vmem:[#allocation16_spill] sm:$0xff] %v2722_v6 }
  0xe0   :  { %v2724_v7 = vpop.f32.mrf.mxu3  ;;  %v2726_v9 = vpop.f32.mrf.mxu0 }
  0xe1   :  { %3348 = vst [vmem:[#allocation17_spill] sm:$0xff] %v2724_v7  ;;  %v2728_v14 = vpop.f32.mrf.mxu1 }
  0xe3   :  { %613 = vmatmul.bf16.gmra.mxu2 %v89_v8  ;;  %754 = vmatmul.bf16.gmra.mxu0 %v87_v34  ;;  %v91_v34 = vpack.c.bf16 %v57_v21, %v55_v20  ;;  %v62_v20 = vld [vmem:[%s3328_s0 + $0x118] sm:$0xff]  ;;  %v1995_v21 = vld [vmem:[%s3333_s5 + $0xa4] sm:$0xf] }
  0xe4   :  { %827 = vmatmul.bf16.gmra.mxu1 %v88_v36  ;;  %v1886_v48 = vor.u32 %v1995_v21, %v1883_v26  ;;  %v1809_v26 = vld [vmem:[%s3333_s5 + $0x10] sm:$0xf] }
  0xe5   :  { %686 = vmatmul.bf16.gmra.mxu3 %v90_v12 }
  0xe6   :  { %v2730_v16 = vpop.f32.mrf.mxu2  ;;  %1421 = vmatpush.bf16.msra.mxu1 %v1886_v48  ;;  %v1978_v48 = vld [vmem:[%s3333_s5 + $0x14] sm:$0xf0] }
  0xe7   :  { %3349 = vst [vmem:[#allocation18_spill] sm:$0xff] %v2730_v16 }
  0xe8   :  { %v2732_v17 = vpop.f32.mrf.mxu3  ;;  %v2734_v18 = vpop.f32.mrf.mxu0 }
  0xe9   :  { %3350 = vst [vmem:[#allocation19_spill] sm:$0xff] %v2732_v17  ;;  %v2736_v19 = vpop.f32.mrf.mxu1 }
  0xee   :  { %v2750_v28 = vpop.f32.mrf.mxu2 }
  0xef   :  { %3351 = vst [vmem:[#allocation20_spill] sm:$0xff] %v2750_v28 }
  0xf0   :  { %v2752_v29 = vpop.f32.mrf.mxu3  ;;  %v2754_v36 = vpop.f32.mrf.mxu0 }
  0xf1   :  { %3352 = vst [vmem:[#allocation21_spill] sm:$0xff] %v2752_v29  ;;  %v2756_v39 = vpop.f32.mrf.mxu1  ;;  %v1977_v29 = vld [vmem:[%s3333_s5 + $0x14] sm:$0xf] }
  0xf3   :  { %618 = vmatmul.bf16.gmra.mxu2 %v91_v34  ;;  %759 = vmatmul.bf16.gmra.mxu0 %v89_v8  ;;  %v61_v8 = vld [vmem:[%s3328_s0 + $0x110] sm:$0xff] }
  0xf4   :  { %832 = vmatmul.bf16.gmra.mxu1 %v90_v12  ;;  %v60_v12 = vld [vmem:[%s3328_s0 + $0x108] sm:$0xff]  ;;  %v93_v52 = vpack.c.bf16 %v61_v8, %v59_v5  ;;  %v63_v5 = vld [vmem:[%s3328_s0 + $0x120] sm:$0xff] }
  0xf5   :  { %691 = vmatmul.bf16.gmra.mxu3 %v92_v38  ;;  %v94_v58 = vpack.c.bf16 %v62_v20, %v60_v12 }
  0xf6   :  { %v2758_v42 = vpop.f32.mrf.mxu2 }
  0xf7   :  { %3353 = vst [vmem:[#allocation22_spill] sm:$0xff] %v2758_v42 }
  0xf8   :  { %v2760_v47 = vpop.f32.mrf.mxu3  ;;  %v2771_v53 = vpop.f32.mrf.mxu0 }
  0xf9   :  { %3354 = vst [vmem:[#allocation23_spill] sm:$0xff] %v2760_v47  ;;  %v2782_v2 = vpop.f32.mrf.mxu1 }
  0xfe   :  { %v340_v27 = vpop.f32.mrf.mxu2 }
 0x100   :  { %v413_v50 = vpop.f32.mrf.mxu3  ;;  %v2802_v56 = vpop.f32.mrf.mxu0 }
 0x101   :  { %v2804_v0 = vpop.f32.mrf.mxu1  ;;  %v1873_v50 = vld [vmem:[%s3333_s5 + $0x90] sm:$0xf] }
 0x102   :  { %3355 = vst [vmem:[#allocation24_spill] sm:$0xff] %v2804_v0 }
 0x103   :  { %623 = vmatmul.bf16.gmra.mxu2 %v93_v52  ;;  %764 = vmatmul.bf16.gmra.mxu0 %v91_v34  ;;  %v65_v34 = vld [vmem:[%s3328_s0 + $0x130] sm:$0xff] }
 0x104   :  { %837 = vmatmul.bf16.gmra.mxu1 %v92_v38  ;;  %v64_v38 = vld [vmem:[%s3328_s0 + $0x128] sm:$0xff]  ;;  %v95_v20 = vpack.c.bf16 %v65_v34, %v63_v5  ;;  %v1994_v5 = vld [vmem:[%s3333_s5 + $0x94] sm:$0xf0] }
 0x105   :  { %696 = vmatmul.bf16.gmra.mxu3 %v94_v58  ;;  %v1874_v17 = vor.u32 %v1994_v5, %v1873_v50 }
 0x106   :  { %v584_v1 = vpop.f32.mrf.mxu2 }
 0x107   :  { %v585_v3 = vadd.f32 %v584_v1, %v2542_v31  ;;  %v66_v31 = vld [vmem:[%s3328_s0 + $0x138] sm:$0xff]  ;;  %1276 = vmatpush.bf16.msra.mxu3 %v1874_v17 }
 0x108   :  { %v657_v4 = vpop.f32.mrf.mxu3  ;;  %v2807_v47 = vpop.f32.mrf.mxu0  ;;  %v1875_v17 = vld [vmem:[%s3333_s5 + $0x98] sm:$0xf0] }
 0x109   :  { %v2809_v27 = vadd.f32 %v657_v4, %v585_v3  ;;  %v2811_v21 = vpop.f32.mrf.mxu1  ;;  %v96_v3 = vpack.c.bf16 %v66_v31, %v64_v38  ;;  %v1810_v4 = vor.u32 %v1978_v48, %v1809_v26  ;;  %v1811_v38 = vld [vmem:[%s3333_s5 + $0x18] sm:$0xf0] }
 0x10a   :  { %3356 = vst [vmem:[#allocation25_spill] sm:$0xff] %v2811_v21  ;;  %v1814_v26 = vor.u32 %v1977_v29, %v1811_v38  ;;  %v69_v29 = vld [vmem:[%s3328_s0 + $0x150] sm:$0xff]  ;;  %v68_v38 = vld [vmem:[%s3328_s0 + $0x148] sm:$0xff] }
 0x10b   :  { %1203 = vmatpush.bf16.msra.mxu2 %v1810_v4 }
 0x10c   :  { %1349 = vmatpush.bf16.msra.mxu0 %v1814_v26 }
 0x10e   :  { %v2825_v8 = vpop.f32.mrf.mxu2 }
 0x110   :  { %v2827_v12 = vpop.f32.mrf.mxu3  ;;  %v2838_v1 = vpop.f32.mrf.mxu0 }
 0x111   :  { %v2843_v34 = vpop.f32.mrf.mxu1 }
 0x113   :  { %628 = vmatmul.bf16.gmra.mxu2 %v95_v20  ;;  %769 = vmatmul.bf16.gmra.mxu0 %v93_v52  ;;  %v1993_v52 = vld [vmem:[%s3333_s5 + $0x94] sm:$0xf] }
 0x114   :  { %842 = vmatmul.bf16.gmra.mxu1 %v94_v58  ;;  %v1878_v50 = vor.u32 %v1993_v52, %v1875_v17 }
 0x115   :  { %701 = vmatmul.bf16.gmra.mxu3 %v96_v3 }
 0x116   :  { %v589_v31 = vpop.f32.mrf.mxu2  ;;  %1422 = vmatpush.bf16.msra.mxu1 %v1878_v50 }
 0x117   :  { %v590_v48 = vadd.f32 %v589_v31, %v2594_v57  ;;  %v67_v57 = vld [vmem:[%s3328_s0 + $0x140] sm:$0xff] }
 0x118   :  { %v662_v28 = vpop.f32.mrf.mxu3  ;;  %v2858_v58 = vpop.f32.mrf.mxu0 }
 0x119   :  { %v2860_v4 = vadd.f32 %v662_v28, %v590_v48  ;;  %v2862_v5 = vpop.f32.mrf.mxu1  ;;  %v70_v28 = vld [vmem:[%s3328_s0 + $0x158] sm:$0xff]  ;;  %v97_v48 = vpack.c.bf16 %v69_v29, %v67_v57  ;;  %v1976_v57 = vld [vmem:[%s3333_s5 + $0x4] sm:$0xf0] }
 0x11a   :  { %v98_v17 = vpack.c.bf16 %v70_v28, %v68_v38  ;;  %v1802_v38 = vor.u32 %v1976_v57, %v1801_v23  ;;  %v73_v23 = vld [vmem:[%s3328_s0 + $0x170] sm:$0xff]  ;;  %v72_v57 = vld [vmem:[%s3328_s0 + $0x168] sm:$0xff] }
 0x11c   :  { %1204 = vmatpush.bf16.msra.mxu2 %v1802_v38 }
 0x11e   :  { %v2876_v31 = vpop.f32.mrf.mxu2 }
 0x120   :  { %v2878_v26 = vpop.f32.mrf.mxu3  ;;  %v2880_v52 = vpop.f32.mrf.mxu0 }
 0x121   :  { %v2882_v50 = vpop.f32.mrf.mxu1 }
 0x123   :  { %633 = vmatmul.bf16.gmra.mxu2 %v97_v48  ;;  %774 = vmatmul.bf16.gmra.mxu0 %v95_v20  ;;  %v1865_v20 = vld [vmem:[%s3333_s5 + $0x80] sm:$0xf] }
 0x124   :  { %847 = vmatmul.bf16.gmra.mxu1 %v96_v3 }
 0x125   :  { %706 = vmatmul.bf16.gmra.mxu3 %v98_v17 }
 0x126   :  { %v594_v45 = vpop.f32.mrf.mxu2 }
 0x127   :  { %v595_v7 = vadd.f32 %v594_v45, %v2634_v13  ;;  %v1992_v13 = vld [vmem:[%s3333_s5 + $0x84] sm:$0xf0] }
 0x128   :  { %v667_v6 = vpop.f32.mrf.mxu3  ;;  %v2891_v29 = vpop.f32.mrf.mxu0  ;;  %v1866_v28 = vor.u32 %v1992_v13, %v1865_v20  ;;  %v99_v20 = vpack.c.bf16 %v73_v23, %v71_v32  ;;  %v1975_v13 = vld [vmem:[%s3333_s5 + $0x4] sm:$0xf]  ;;  %v1867_v32 = vld [vmem:[%s3333_s5 + $0x88] sm:$0xf0] }
 0x129   :  { %v2899_v45 = vadd.f32 %v667_v6, %v595_v7  ;;  %v2901_v3 = vpop.f32.mrf.mxu1  ;;  %v74_v6 = vld [vmem:[%s3328_s0 + $0x178] sm:$0xff]  ;;  %v1870_v10 = vor.u32 %v1991_v11, %v1867_v32  ;;  %v75_v11 = vld [vmem:[%s3328_s0 + $0x180] sm:$0xff]  ;;  %v587_v32 = vadd.f32 %v2825_v8, %v2568_v44 }
 0x12a   :  { %1277 = vmatpush.bf16.msra.mxu3 %v1866_v28  ;;  %v1803_v28 = vld [vmem:[%s3333_s5 + $0x8] sm:$0xf0]  ;;  %v100_v42 = vpack.c.bf16 %v74_v6, %v72_v57 }
 0x12b   :  { %v1806_v61 = vor.u32 %v1975_v13, %v1803_v28  ;;  %1423 = vmatpush.bf16.msra.mxu1 %v1870_v10 }
 0x12d   :  { %1350 = vmatpush.bf16.msra.mxu0 %v1806_v61  ;;  %v76_v61 = vld [vmem:[%s3328_s0 + $0x188] sm:$0xff] }
 0x12e   :  { %v2915_v7 = vpop.f32.mrf.mxu2 }
 0x130   :  { %v2917_v38 = vpop.f32.mrf.mxu3  ;;  %v2925_v30 = vpop.f32.mrf.mxu0 }
 0x131   :  { %v2933_v23 = vpop.f32.mrf.mxu1 }
 0x133   :  { %638 = vmatmul.bf16.gmra.mxu2 %v99_v20  ;;  %779 = vmatmul.bf16.gmra.mxu0 %v97_v48 }
 0x134   :  { %852 = vmatmul.bf16.gmra.mxu1 %v98_v17  ;;  %v102_v17 = vpack.c.bf16 %v76_v61, %v76_v61  ;;  %v660_v61 = vadd.f32 %v2827_v12, %v587_v32 }
 0x135   :  { %711 = vmatmul.bf16.gmra.mxu3 %v100_v42 }
 0x136   :  { %v599_v16 = vpop.f32.mrf.mxu2 }
 0x137   :  { %v600_v57 = vadd.f32 %v599_v16, %v2674_v35  ;;  %v101_v35 = vpack.c.bf16 %v75_v11, %v75_v11  ;;  %v731_v11 = vadd.f32 %v2838_v1, %v2544_v33  ;;  %v875_v33 = vadd.f32 %v2967_v54, %v660_v61 }
 0x138   :  { %v672_v6 = vpop.f32.mrf.mxu3  ;;  %v2936_v13 = vpop.f32.mrf.mxu0 }
 0x139   :  { %v2938_v28 = vadd.f32 %v672_v6, %v600_v57  ;;  %v2940_v41 = vpop.f32.mrf.mxu1  ;;  %v733_v6 = vadd.f32 %v2858_v58, %v2570_v46  ;;  %v925_v32 = vmax.f32 %v875_v33, 0.0 }
 0x13b   :  { %v806_v44 = vadd.f32 %v2862_v5, %v733_v6  ;;  %v873_v5 = vadd.f32 %v2967_v54, %v2809_v27  ;;  %v738_v27 = vadd.f32 %v2891_v29, %v2604_v63 }
 0x13d   :  { %v876_v12 = vadd.f32 %v2971_v43, %v806_v44  ;;  %v923_v55 = vmax.f32 %v873_v5, 0.0 }
 0x13e   :  { %v2948_v48 = vpop.f32.mrf.mxu2 }
 0x13f   :  { %v926_v6 = vmax.f32 %v876_v12, 0.0  ;;  %v811_v12 = vadd.f32 %v2901_v3, %v738_v27 }
 0x140   :  { %v2950_v10 = vpop.f32.mrf.mxu3  ;;  %v2952_v16 = vpop.f32.mrf.mxu0 }
 0x141   :  { %v2956_v57 = vpop.f32.mrf.mxu1 }
 0x143   :  { %643 = vmatmul.bf16.gmra.mxu2 %v101_v35  ;;  %784 = vmatmul.bf16.gmra.mxu0 %v99_v20  ;;  %v804_v20 = vadd.f32 %v2843_v34, %v731_v11 }
 0x144   :  { %857 = vmatmul.bf16.gmra.mxu1 %v100_v42 }
 0x145   :  { %716 = vmatmul.bf16.gmra.mxu3 %v102_v17 }
 0x146   :  { %v604_v8 = vpop.f32.mrf.mxu2 }
 0x147   :  { %v605_v46 = vadd.f32 %v604_v8, %v2726_v9  ;;  %v874_v9 = vadd.f32 %v2971_v43, %v804_v20  ;;  %v736_v20 = vadd.f32 %v2880_v52, %v2596_v59  ;;  %v880_v59 = vadd.f32 %v2971_v43, %v811_v12 }
 0x148   :  { %v677_v58 = vpop.f32.mrf.mxu3  ;;  %v2973_v0 = vpop.f32.mrf.mxu0  ;;  %v741_v12 = vadd.f32 %v2925_v30, %v2636_v15  ;;  %v881_v30 = vadd.f32 %v2967_v54, %v2899_v45 }
 0x149   :  { %v2976_v1 = vadd.f32 %v677_v58, %v605_v46  ;;  %v2978_v42 = vpop.f32.mrf.mxu1  ;;  %v924_v8 = vmax.f32 %v874_v9, 0.0  ;;  %v973_v46 = vpack.c.bf16 %v925_v32, %v923_v55  ;;  %v592_v58 = vadd.f32 %v2876_v31, %v2602_v62 }
 0x14a   :  { %v809_v9 = vadd.f32 %v2882_v50, %v736_v20  ;;  %v748_v45 = vadd.f32 %v2973_v0, %v2696_v51 }
 0x14b   :  { %v974_v21 = vpack.c.bf16 %v926_v6, %v924_v8  ;;  %v665_v33 = vadd.f32 %v2878_v26, %v592_v58  ;;  %v877_v26 = vadd.f32 %v2967_v54, %v2860_v4  ;;  %v597_v58 = vadd.f32 %v2915_v7, %v2654_v24 }
 0x14c   :  { %v878_v52 = vadd.f32 %v2971_v43, %v809_v9  ;;  %v743_v4 = vadd.f32 %v2936_v13, %v2656_v25  ;;  %v814_v9 = vadd.f32 %v2933_v23, %v741_v12  ;;  %v931_v23 = vmax.f32 %v881_v30, 0.0 }
 0x14d   :  { %v879_v63 = vadd.f32 %v2967_v54, %v665_v33  ;;  %v927_v50 = vmax.f32 %v877_v26, 0.0  ;;  %v821_v12 = vadd.f32 %v2978_v42, %v748_v45 }
 0x14e   :  { %v2984_v34 = vpop.f32.mrf.mxu2  ;;  %v928_v55 = vmax.f32 %v878_v52, 0.0 }
 0x14f   :  { %v929_v3 = vmax.f32 %v879_v63, 0.0 }
 0x150   :  { %v2986_v11 = vpop.f32.mrf.mxu3  ;;  %v2988_v61 = vpop.f32.mrf.mxu0 }
 0x151   :  { %v2992_v44 = vpop.f32.mrf.mxu1  ;;  %v975_v20 = vpack.c.bf16 %v929_v3, %v927_v50  ;;  %v602_v3 = vadd.f32 %v2948_v48, %v2694_v49 }
 0x153   :  { %789 = vmatmul.bf16.gmra.mxu0 %v101_v35  ;;  %1205 = vmatmul.bf16.vlgmr.msra.gmra.mxu2 %v973_v46 }
 0x154   :  { %862 = vmatmul.bf16.gmra.mxu1 %v102_v17 }
 0x155   :  { %1278 = vmatmul.bf16.vlgmr.msra.gmra.mxu3 %v974_v21 }
 0x156   :  { %v609_v5 = vpop.f32.mrf.mxu2 }
 0x157   :  { %v610_v62 = vadd.f32 %v609_v5, %v2754_v36  ;;  %v930_v36 = vmax.f32 %v880_v59, 0.0  ;;  %v670_v5 = vadd.f32 %v2917_v38, %v597_v58  ;;  %v746_v58 = vadd.f32 %v2952_v16, %v2676_v37 }
 0x158   :  { %v682_v31 = vpop.f32.mrf.mxu3  ;;  %v3002_v32 = vpop.f32.mrf.mxu0  ;;  %v888_v37 = vadd.f32 %v2971_v43, %v821_v12 }
 0x159   :  { %v3005_v29 = vadd.f32 %v682_v31, %v610_v62  ;;  %v3007_v35 = vpop.f32.mrf.mxu1  ;;  %v976_v33 = vpack.c.bf16 %v930_v36, %v928_v55  ;;  %v816_v62 = vadd.f32 %v2940_v41, %v743_v4  ;;  %v883_v25 = vadd.f32 %v2967_v54, %v670_v5 }
 0x15a   :  { %v882_v41 = vadd.f32 %v2971_v43, %v814_v9  ;;  %v675_v4 = vadd.f32 %v2950_v10, %v602_v3  ;;  %v885_v10 = vadd.f32 %v2967_v54, %v2938_v28  ;;  %v753_v28 = vadd.f32 %v3002_v32, %v2736_v19 }
 0x15b   :  { %v884_v15 = vadd.f32 %v2971_v43, %v816_v62  ;;  %v819_v62 = vadd.f32 %v2956_v57, %v746_v58 }
 0x15c   :  { %v932_v26 = vmax.f32 %v882_v41, 0.0  ;;  %v887_v51 = vadd.f32 %v2967_v54, %v675_v4  ;;  %v935_v57 = vmax.f32 %v885_v10, 0.0 }
 0x15d   :  { %v886_v16 = vadd.f32 %v2971_v43, %v819_v62 }
 0x15e   :  { %v3013_v17 = vpop.f32.mrf.mxu2  ;;  %v937_v42 = vmax.f32 %v887_v51, 0.0 }
 0x160   :  { %v3015_v6 = vpop.f32.mrf.mxu3  ;;  %v3017_v8 = vpop.f32.mrf.mxu0  ;;  %v979_v30 = vpack.c.bf16 %v937_v42, %v935_v57 }
 0x161   :  { %v3021_v27 = vpop.f32.mrf.mxu1  ;;  %v756_v51 = vadd.f32 %v3017_v8, %v2756_v39 }
 0x163   :  { %1210 = vmatmul.bf16.gmra.mxu2 %v975_v20  ;;  %1351 = vmatmul.bf16.vlgmr.msra.gmra.mxu0 %v973_v46  ;;  %v829_v42 = vadd.f32 %v3021_v27, %v756_v51 }
 0x164   :  { %1424 = vmatmul.bf16.vlgmr.msra.gmra.mxu1 %v974_v21  ;;  %v933_v21 = vmax.f32 %v883_v25, 0.0  ;;  %v607_v25 = vadd.f32 %v2984_v34, %v2734_v18 }
 0x165   :  { %1283 = vmatmul.bf16.gmra.mxu3 %v976_v33  ;;  %v894_v8 = vadd.f32 %v2971_v43, %v829_v42 }
 0x166   :  { %v614_v31 = vpop.f32.mrf.mxu2  ;;  %v977_v50 = vpack.c.bf16 %v933_v21, %v931_v23  ;;  %v751_v21 = vadd.f32 %v2988_v61, %v2728_v14  ;;  %v826_v23 = vadd.f32 %v3007_v35, %v753_v28 }
 0x167   :  { %v615_v24 = vadd.f32 %v614_v31, %v2802_v56  ;;  %v934_v56 = vmax.f32 %v884_v15, 0.0 }
 0x168   :  { %v687_v7 = vpop.f32.mrf.mxu3  ;;  %v3031_v63 = vpop.f32.mrf.mxu0  ;;  %v824_v3 = vadd.f32 %v2992_v44, %v751_v21  ;;  %v892_v14 = vadd.f32 %v2971_v43, %v826_v23  ;;  %v3357_v23 = vld [vmem:[#allocation25_spill] sm:$0xff] }
 0x169   :  { %v3034_v13 = vadd.f32 %v687_v7, %v615_v24  ;;  %v3036_v46 = vpop.f32.mrf.mxu1  ;;  %v978_v55 = vpack.c.bf16 %v934_v56, %v932_v26  ;;  %v936_v7 = vmax.f32 %v886_v16, 0.0  ;;  %v680_v56 = vadd.f32 %v2986_v11, %v607_v25 }
 0x16a   :  { %v889_v11 = vadd.f32 %v2967_v54, %v2976_v1  ;;  %v890_v61 = vadd.f32 %v2971_v43, %v824_v3  ;;  %v758_v1 = vadd.f32 %v3031_v63, %v2782_v2 }
 0x16b   :  { %v891_v19 = vadd.f32 %v2967_v54, %v680_v56 }
 0x16c   :  { %v939_v44 = vmax.f32 %v889_v11, 0.0  ;;  %v940_v4 = vmax.f32 %v890_v61, 0.0  ;;  %v831_v10 = vadd.f32 %v3036_v46, %v758_v1 }
 0x16d   :  { %v941_v35 = vmax.f32 %v891_v19, 0.0 }
 0x16e   :  { %v3042_v38 = vpop.f32.mrf.mxu2  ;;  %v896_v39 = vadd.f32 %v2971_v43, %v831_v10 }
 0x170   :  { %v3044_v59 = vpop.f32.mrf.mxu3  ;;  %v3046_v52 = vpop.f32.mrf.mxu0 }
 0x171   :  { %v3050_v36 = vpop.f32.mrf.mxu1 }
 0x173   :  { %1215 = vmatmul.bf16.gmra.mxu2 %v977_v50  ;;  %1356 = vmatmul.bf16.gmra.mxu0 %v975_v20 }
 0x174   :  { %1429 = vmatmul.bf16.gmra.mxu1 %v976_v33 }
 0x175   :  { %1288 = vmatmul.bf16.gmra.mxu3 %v978_v55 }
 0x176   :  { %v619_v5 = vpop.f32.mrf.mxu2 }
 0x177   :  { %v620_v49 = vadd.f32 %v619_v5, %v2558_v40  ;;  %v938_v40 = vmax.f32 %v888_v37, 0.0  ;;  %v612_v5 = vadd.f32 %v3013_v17, %v2771_v53 }
 0x178   :  { %v692_v48 = vpop.f32.mrf.mxu3  ;;  %v3060_v31 = vpop.f32.mrf.mxu0 }
 0x179   :  { %v3063_v0 = vadd.f32 %v692_v48, %v620_v49  ;;  %v3065_v20 = vpop.f32.mrf.mxu1  ;;  %v980_v41 = vpack.c.bf16 %v938_v40, %v936_v7  ;;  %v981_v48 = vpack.c.bf16 %v941_v35, %v939_v44  ;;  %v685_v37 = vadd.f32 %v3015_v6, %v612_v5 }
 0x17a   :  { %v893_v6 = vadd.f32 %v2967_v54, %v3005_v29  ;;  %v763_v29 = vadd.f32 %v3060_v31, %v3357_v23 }
 0x17b   :  { %v895_v2 = vadd.f32 %v2967_v54, %v685_v37  ;;  %v3360_v37 = vld [vmem:[#allocation6_spill] sm:$0xff] }
 0x17c   :  { %v943_v27 = vmax.f32 %v893_v6, 0.0  ;;  %v836_v19 = vadd.f32 %v3065_v20, %v763_v29 }
 0x17d   :  { %v945_v46 = vmax.f32 %v895_v2, 0.0  ;;  %v3362_v2 = vld [vmem:[#allocation5_spill] sm:$0xff] }
 0x17e   :  { %v3071_v33 = vpop.f32.mrf.mxu2 }
 0x17f   :  { %v983_v56 = vpack.c.bf16 %v945_v46, %v943_v27  ;;  %v622_v10 = vadd.f32 %v3071_v33, %v3360_v37  ;;  %v3363_v33 = vld [vmem:[#allocation18_spill] sm:$0xff] }
 0x180   :  { %v3073_v24 = vpop.f32.mrf.mxu3  ;;  %v3075_v9 = vpop.f32.mrf.mxu0 }
 0x181   :  { %v3079_v15 = vpop.f32.mrf.mxu1  ;;  %v695_v6 = vadd.f32 %v3073_v24, %v622_v10  ;;  %v901_v24 = vadd.f32 %v2967_v54, %v3063_v0 }
 0x183   :  { %1220 = vmatmul.bf16.gmra.mxu2 %v979_v30  ;;  %1361 = vmatmul.bf16.gmra.mxu0 %v977_v50 }
 0x184   :  { %1434 = vmatmul.bf16.gmra.mxu1 %v978_v55 }
 0x185   :  { %1293 = vmatmul.bf16.gmra.mxu3 %v980_v41 }
 0x186   :  { %v624_v26 = vpop.f32.mrf.mxu2 }
 0x187   :  { %v625_v18 = vadd.f32 %v624_v26, %v2598_v60  ;;  %v942_v60 = vmax.f32 %v892_v14, 0.0 }
 0x188   :  { %v697_v34 = vpop.f32.mrf.mxu3  ;;  %v3089_v45 = vpop.f32.mrf.mxu0 }
 0x189   :  { %v3092_v32 = vadd.f32 %v697_v34, %v625_v18  ;;  %v3094_v50 = vpop.f32.mrf.mxu1  ;;  %v982_v62 = vpack.c.bf16 %v942_v60, %v940_v4  ;;  %v3358_v18 = vld [vmem:[#allocation24_spill] sm:$0xff] }
 0x18a   :  { %v761_v34 = vadd.f32 %v3046_v52, %v3358_v18  ;;  %v900_v52 = vadd.f32 %v2971_v43, %v836_v19 }
 0x18c   :  { %v834_v61 = vadd.f32 %v3050_v36, %v761_v34  ;;  %v950_v5 = vmax.f32 %v900_v52, 0.0  ;;  %v3366_v52 = vld [vmem:[#allocation8_spill] sm:$0xff] }
 0x18e   :  { %v3100_v55 = vpop.f32.mrf.mxu2  ;;  %v898_v20 = vadd.f32 %v2971_v43, %v834_v61  ;;  %v3365_v61 = vld [vmem:[#allocation10_spill] sm:$0xff] }
 0x190   :  { %v3102_v58 = vpop.f32.mrf.mxu3  ;;  %v3104_v12 = vpop.f32.mrf.mxu0 }
 0x191   :  { %v3108_v49 = vpop.f32.mrf.mxu1 }
 0x193   :  { %1225 = vmatmul.bf16.gmra.mxu2 %v981_v48  ;;  %1366 = vmatmul.bf16.gmra.mxu0 %v979_v30  ;;  %v944_v30 = vmax.f32 %v894_v8, 0.0 }
 0x194   :  { %1439 = vmatmul.bf16.gmra.mxu1 %v980_v41  ;;  %v617_v41 = vadd.f32 %v3042_v38, %v2807_v47  ;;  %v3359_v47 = vld [vmem:[#allocation14_spill] sm:$0xff] }
 0x195   :  { %1298 = vmatmul.bf16.gmra.mxu3 %v982_v62 }
 0x196   :  { %v629_v16 = vpop.f32.mrf.mxu2  ;;  %v690_v3 = vadd.f32 %v3044_v59, %v617_v41  ;;  %v897_v59 = vadd.f32 %v2967_v54, %v3034_v13 }
 0x197   :  { %v630_v53 = vadd.f32 %v629_v16, %v2650_v22  ;;  %v946_v22 = vmax.f32 %v896_v39, 0.0  ;;  %v766_v39 = vadd.f32 %v3075_v9, %v3362_v2 }
 0x198   :  { %v702_v17 = vpop.f32.mrf.mxu3  ;;  %v3118_v40 = vpop.f32.mrf.mxu0  ;;  %v899_v31 = vadd.f32 %v2967_v54, %v690_v3  ;;  %v947_v36 = vmax.f32 %v897_v59, 0.0  ;;  %v771_v59 = vadd.f32 %v3104_v12, %v3366_v52 }
 0x199   :  { %v3121_v63 = vadd.f32 %v702_v17, %v630_v53  ;;  %v3123_v57 = vpop.f32.mrf.mxu1  ;;  %v984_v26 = vpack.c.bf16 %v946_v22, %v944_v30  ;;  %v3361_v17 = vld [vmem:[#allocation7_spill] sm:$0xff]  ;;  %v839_v30 = vadd.f32 %v3079_v15, %v766_v39  ;;  %v951_v15 = vmax.f32 %v901_v24, 0.0 }
 0x19a   :  { %v949_v4 = vmax.f32 %v899_v31, 0.0  ;;  %v768_v13 = vadd.f32 %v3089_v45, %v3361_v17  ;;  %v903_v45 = vadd.f32 %v2967_v54, %v695_v6  ;;  %v773_v0 = vadd.f32 %v3118_v40, %v3365_v61 }
 0x19b   :  { %v844_v37 = vadd.f32 %v3108_v49, %v771_v59 }
 0x19c   :  { %v985_v53 = vpack.c.bf16 %v949_v4, %v947_v36  ;;  %v841_v8 = vadd.f32 %v3094_v50, %v768_v13  ;;  %v902_v50 = vadd.f32 %v2971_v43, %v839_v30  ;;  %v953_v29 = vmax.f32 %v903_v45, 0.0  ;;  %v3369_v30 = vld [vmem:[#allocation13_spill] sm:$0xff] }
 0x19d   :  { %v846_v4 = vadd.f32 %v3123_v57, %v773_v0  ;;  %v906_v57 = vadd.f32 %v2971_v43, %v844_v37 }
 0x19e   :  { %v3129_v7 = vpop.f32.mrf.mxu2  ;;  %v904_v9 = vadd.f32 %v2971_v43, %v841_v8  ;;  %v952_v3 = vmax.f32 %v902_v50, 0.0 }
 0x19f   :  { %v908_v12 = vadd.f32 %v2971_v43, %v846_v4  ;;  %v956_v6 = vmax.f32 %v906_v57, 0.0 }
 0x1a0   :  { %v3131_v25 = vpop.f32.mrf.mxu3  ;;  %v3133_v28 = vpop.f32.mrf.mxu0 }
 0x1a1   :  { %v3137_v21 = vpop.f32.mrf.mxu1 }
 0x1a3   :  { %1230 = vmatmul.bf16.gmra.mxu2 %v983_v56  ;;  %1371 = vmatmul.bf16.gmra.mxu0 %v981_v48 }
 0x1a4   :  { %1444 = vmatmul.bf16.gmra.mxu1 %v982_v62  ;;  %v948_v62 = vmax.f32 %v898_v20, 0.0 }
 0x1a5   :  { %1303 = vmatmul.bf16.gmra.mxu3 %v984_v26 }
 0x1a6   :  { %v634_v14 = vpop.f32.mrf.mxu2  ;;  %v986_v42 = vpack.c.bf16 %v950_v5, %v948_v62 }
 0x1a7   :  { %v635_v38 = vadd.f32 %v634_v14, %v3359_v47  ;;  %v3364_v14 = vld [vmem:[#allocation9_spill] sm:$0xff] }
 0x1a8   :  { %v707_v11 = vpop.f32.mrf.mxu3  ;;  %v3147_v35 = vpop.f32.mrf.mxu0  ;;  %v627_v47 = vadd.f32 %v3100_v55, %v3364_v14  ;;  %v3367_v55 = vld [vmem:[#allocation22_spill] sm:$0xff] }
 0x1a9   :  { %v3150_v60 = vadd.f32 %v707_v11, %v635_v38  ;;  %v3152_v44 = vpop.f32.mrf.mxu1  ;;  %v987_v11 = vpack.c.bf16 %v953_v29, %v951_v15  ;;  %v778_v45 = vadd.f32 %v3147_v35, %v3369_v30 }
 0x1aa   :  { %v700_v20 = vadd.f32 %v3102_v58, %v627_v47  ;;  %v905_v58 = vadd.f32 %v2967_v54, %v3092_v32 }
 0x1ab   :  { %v851_v29 = vadd.f32 %v3152_v44, %v778_v45 }
 0x1ac   :  { %v907_v40 = vadd.f32 %v2967_v54, %v700_v20  ;;  %v955_v39 = vmax.f32 %v905_v58, 0.0 }
 0x1ae   :  { %v3158_v48 = vpop.f32.mrf.mxu2  ;;  %v957_v13 = vmax.f32 %v907_v40, 0.0 }
 0x1b0   :  { %v3160_v1 = vpop.f32.mrf.mxu3  ;;  %v3162_v51 = vpop.f32.mrf.mxu0 }
 0x1b1   :  { %v3166_v16 = vpop.f32.mrf.mxu1 }
 0x1b3   :  { %1235 = vmatmul.bf16.gmra.mxu2 %v985_v53  ;;  %1376 = vmatmul.bf16.gmra.mxu0 %v983_v56 }
 0x1b4   :  { %1449 = vmatmul.bf16.gmra.mxu1 %v984_v26  ;;  %v954_v26 = vmax.f32 %v904_v9, 0.0  ;;  %v3370_v9 = vld [vmem:[#allocation11_spill] sm:$0xff] }
 0x1b5   :  { %1308 = vmatmul.bf16.gmra.mxu3 %v986_v42  ;;  %v776_v24 = vadd.f32 %v3133_v28, %v3370_v9 }
 0x1b6   :  { %v639_v46 = vpop.f32.mrf.mxu2  ;;  %v988_v31 = vpack.c.bf16 %v954_v26, %v952_v3 }
 0x1b7   :  { %v640_v22 = vadd.f32 %v639_v46, %v3363_v33  ;;  %v3368_v46 = vld [vmem:[#allocation12_spill] sm:$0xff]  ;;  %v849_v35 = vadd.f32 %v3137_v21, %v776_v24 }
 0x1b8   :  { %v712_v27 = vpop.f32.mrf.mxu3  ;;  %v3176_v41 = vpop.f32.mrf.mxu0  ;;  %v632_v33 = vadd.f32 %v3129_v7, %v3368_v46  ;;  %v1031_v7 = vld [vmem:[%s3334_s6] sm:$0x3]  ;;  %s2052_s6 = smov [#allocation2]  }
 0x1b9   :  { %v3179_v56 = vadd.f32 %v712_v27, %v640_v22  ;;  %v3181_v23 = vpop.f32.mrf.mxu1  ;;  %v989_v27 = vpack.c.bf16 %v957_v13, %v955_v39  ;;  %v3233_v47 = vperm.slane %v1031_v7, 0  ;;  %v910_v44 = vadd.f32 %v2971_v43, %v849_v35  ;;  %s1593_s25 = sshll.u32 %s2052_s6, 4  ;;  %s1594_s25 = int_to_ptr.vmem [resolvable:$true] %s1593_s25 }
 0x1ba   :  { %v705_v50 = vadd.f32 %v3131_v25, %v632_v33  ;;  %v909_v25 = vadd.f32 %v2967_v54, %v3121_v63 }
 0x1bb   :  { %v960_v4 = vmax.f32 %v910_v44, 0.0 }
 0x1bc   :  { %v911_v14 = vadd.f32 %v2967_v54, %v705_v50  ;;  %v959_v59 = vmax.f32 %v909_v25, 0.0  ;;  %v913_v50 = vadd.f32 %v2967_v54, %v3150_v60 }
 0x1be   :  { %v3187_v18 = vpop.f32.mrf.mxu2  ;;  %v961_v61 = vmax.f32 %v911_v14, 0.0  ;;  %v963_v14 = vmax.f32 %v913_v50, 0.0 }
 0x1c0   :  { %v3189_v34 = vpop.f32.mrf.mxu3  ;;  %v3191_v19 = vpop.f32.mrf.mxu0  ;;  %v991_v40 = vpack.c.bf16 %v961_v61, %v959_v59  ;;  %v3374_v61 = vld [vmem:[#allocation20_spill] sm:$0xff] }
 0x1c1   :  { %v3195_v38 = vpop.f32.mrf.mxu1 }
 0x1c3   :  { %1240 = vmatmul.bf16.gmra.mxu2 %v987_v11  ;;  %1381 = vmatmul.bf16.gmra.mxu0 %v985_v53 }
 0x1c4   :  { %1454 = vmatmul.bf16.gmra.mxu1 %v986_v42  ;;  %v958_v42 = vmax.f32 %v908_v12, 0.0  ;;  %v3372_v12 = vld [vmem:[#allocation17_spill] sm:$0xff] }
 0x1c5   :  { %1313 = vmatmul.bf16.gmra.mxu3 %v988_v31  ;;  %v783_v58 = vadd.f32 %v3176_v41, %v3372_v12 }
 0x1c6   :  { %v644_v5 = vpop.f32.mrf.mxu2  ;;  %v990_v32 = vpack.c.bf16 %v958_v42, %v956_v6  ;;  %v3373_v42 = vld [vmem:[#allocation15_spill] sm:$0xff] }
 0x1c7   :  { %v645_v36 = vadd.f32 %v644_v5, %v3367_v55  ;;  %v3371_v55 = vld [vmem:[#allocation16_spill] sm:$0xff]  ;;  %v856_v46 = vadd.f32 %v3181_v23, %v783_v58 }
 0x1c8   :  { %v717_v62 = vpop.f32.mrf.mxu3  ;;  %v3205_v10 = vpop.f32.mrf.mxu0 }
 0x1c9   :  { %v3208_v53 = vadd.f32 %v717_v62, %v645_v36  ;;  %v3210_v17 = vpop.f32.mrf.mxu1  ;;  %v637_v36 = vadd.f32 %v3158_v48, %v3371_v55 }
 0x1cb   :  { %v710_v39 = vadd.f32 %v3160_v1, %v637_v36  ;;  %v916_v1 = vadd.f32 %v2971_v43, %v856_v46  ;;  %v3376_v36 = vld [vmem:[#allocation19_spill] sm:$0xff] }
 0x1cd   :  { %v966_v35 = vmax.f32 %v916_v1, 0.0 }
 0x1ce   :  { %v646_v2 = vpop.f32.mrf.mxu2 }
 0x1cf   :  { %v781_v2 = vadd.f32 %v3162_v51, %v3373_v42 }
 0x1d0   :  { %v719_v49 = vpop.f32.mrf.mxu3  ;;  %v3216_v8 = vpop.f32.mrf.mxu0 }
 0x1d1   :  { %v3220_v22 = vpop.f32.mrf.mxu1  ;;  %v854_v45 = vadd.f32 %v3166_v16, %v781_v2 }
 0x1d3   :  { %1245 = vmatmul.bf16.gmra.mxu2 %v989_v27  ;;  %1386 = vmatmul.bf16.gmra.mxu0 %v987_v11  ;;  %v912_v11 = vadd.f32 %v2971_v43, %v851_v29  ;;  %v914_v23 = vadd.f32 %v2971_v43, %v854_v45 }
 0x1d4   :  { %1459 = vmatmul.bf16.gmra.mxu1 %v988_v31  ;;  %v3240_v31 = vperm.slane %v1031_v7, 1 }
 0x1d5   :  { %1318 = vmatmul.bf16.gmra.mxu3 %v990_v32  ;;  %v962_v52 = vmax.f32 %v912_v11, 0.0  ;;  %v964_v25 = vmax.f32 %v914_v23, 0.0  ;;  %v3377_v23 = vld [vmem:[#allocation23_spill] sm:$0xff] }
 0x1d6   :  { %v1206_v26 = vpop.f32.mrf.mxu2 }
 0x1d7   :  { %v1207_v0 = vadd.f32 %v1206_v26, %v3233_v47  ;;  %v992_v57 = vpack.c.bf16 %v962_v52, %v960_v4 }
 0x1d8   :  { %v1279_v15 = vpop.f32.mrf.mxu3  ;;  %v792_v3 = vpop.f32.mrf.mxu0 }
 0x1d9   :  { %v865_v28 = vpop.f32.mrf.mxu1  ;;  %v1280_v62 = vadd.f32 %v1279_v15, %v1207_v0  ;;  %v642_v0 = vadd.f32 %v3187_v18, %v3374_v61  ;;  %v921_v61 = vadd.f32 %v2967_v54, %v3208_v53 }
 0x1db   :  { %v1489_v48 = vmax.f32 %v1280_v62, 0.0  ;;  %v786_v62 = vadd.f32 %v3191_v19, %v3376_v36  ;;  %v715_v18 = vadd.f32 %v3189_v34, %v642_v0 }
 0x1dd   :  { %v859_v2 = vadd.f32 %v3195_v38, %v786_v62 }
 0x1de   :  { %v1208_v21 = vpop.f32.mrf.mxu2 }
 0x1df   :  { %v1209_v49 = vadd.f32 %v1208_v21, %v3233_v47 }
 0x1e0   :  { %v1281_v20 = vpop.f32.mrf.mxu3  ;;  %v1352_v5 = vpop.f32.mrf.mxu0 }
 0x1e1   :  { %v1353_v37 = vadd.f32 %v1352_v5, %v3240_v31  ;;  %v1425_v63 = vpop.f32.mrf.mxu1  ;;  %v1282_v24 = vadd.f32 %v1281_v20, %v1209_v49  ;;  %v3375_v20 = vld [vmem:[#allocation21_spill] sm:$0xff]  ;;  %v994_v5 = vpack.c.bf16 %v966_v35, %v964_v25  ;;  %v917_v49 = vadd.f32 %v2967_v54, %v3179_v56 }
 0x1e2   :  { %v788_v4 = vadd.f32 %v3205_v10, %v3375_v20 }
 0x1e3   :  { %v1426_v13 = vadd.f32 %v1425_v63, %v1353_v37  ;;  %1250 = vmatmul.bf16.gmra.mxu2 %v991_v40  ;;  %1391 = vmatmul.bf16.gmra.mxu0 %v989_v27  ;;  %v915_v27 = vadd.f32 %v2967_v54, %v710_v39  ;;  %v1491_v26 = vmax.f32 %v1282_v24, 0.0 }
 0x1e4   :  { %1464 = vmatmul.bf16.gmra.mxu1 %v990_v32  ;;  %v861_v58 = vadd.f32 %v3210_v17, %v788_v4  ;;  %v918_v17 = vadd.f32 %v2971_v43, %v859_v2 }
 0x1e5   :  { %1323 = vmatmul.bf16.gmra.mxu3 %v992_v57  ;;  %v1490_v6 = vmax.f32 %v1426_v13, 0.0  ;;  %v965_v7 = vmax.f32 %v915_v27, 0.0 }
 0x1e6   :  { %v1211_v33 = vpop.f32.mrf.mxu2  ;;  %v920_v34 = vadd.f32 %v2971_v43, %v861_v58 }
 0x1e7   :  { %v1539_v30 = vpack.c.bf16 %v1490_v6, %v1489_v48  ;;  %v1212_v16 = vadd.f32 %v1211_v33, %v3233_v47  ;;  %v993_v59 = vpack.c.bf16 %v965_v7, %v963_v14  ;;  %v791_v7 = vadd.f32 %v3216_v8, %v3377_v23 }
 0x1e8   :  { %v1284_v41 = vpop.f32.mrf.mxu3  ;;  %v1354_v9 = vpop.f32.mrf.mxu0 }
 0x1e9   :  { %1564 = vst [vmem:[#allocation2] sm:$0xff] %v1539_v30  ;;  %v1355_v51 = vadd.f32 %v1354_v9, %v3240_v31  ;;  %v1427_v32 = vpop.f32.mrf.mxu1  ;;  %v1285_v52 = vadd.f32 %v1284_v41, %v1212_v16  ;;  %v970_v41 = vmax.f32 %v920_v34, 0.0  ;;  %v967_v9 = vmax.f32 %v917_v49, 0.0 }
 0x1ea   :  { %v864_v14 = vadd.f32 %v3220_v22, %v791_v7 }
 0x1eb   :  { %v1428_v29 = vadd.f32 %v1427_v32, %v1355_v51  ;;  %v1493_v37 = vmax.f32 %v1285_v52, 0.0  ;;  %v968_v51 = vmax.f32 %v918_v17, 0.0 }
 0x1ed   :  { %v1492_v15 = vmax.f32 %v1428_v29, 0.0 }
 0x1ee   :  { %v1213_v3 = vpop.f32.mrf.mxu2 }
 0x1ef   :  { %v1540_v28 = vpack.c.bf16 %v1492_v15, %v1491_v26  ;;  %v1214_v63 = vadd.f32 %v1213_v3, %v3233_v47  ;;  %v996_v26 = vpack.c.bf16 %v970_v41, %v968_v51 }
 0x1f0   :  { %v1286_v11 = vpop.f32.mrf.mxu3  ;;  %v1357_v44 = vpop.f32.mrf.mxu0 }
 0x1f1   :  { %1565 = vst [vmem:[#allocation2 + $0x8] sm:$0xff] %v1540_v28  ;;  %v1358_v60 = vadd.f32 %v1357_v44, %v3240_v31  ;;  %v1430_v21 = vpop.f32.mrf.mxu1  ;;  %v1287_v48 = vadd.f32 %v1286_v11, %v1214_v63 }
 0x1f3   :  { %v1431_v55 = vadd.f32 %v1430_v21, %v1358_v60  ;;  %1255 = vmatmul.bf16.gmra.mxu2 %v993_v59  ;;  %1396 = vmatmul.bf16.gmra.mxu0 %v991_v40  ;;  %v919_v40 = vadd.f32 %v2967_v54, %v715_v18  ;;  %v1495_v33 = vmax.f32 %v1287_v48, 0.0  ;;  %v922_v60 = vadd.f32 %v2971_v43, %v864_v14 }
 0x1f4   :  { %1469 = vmatmul.bf16.gmra.mxu1 %v992_v57 }
 0x1f5   :  { %1328 = vmatmul.bf16.gmra.mxu3 %v994_v5  ;;  %v1494_v12 = vmax.f32 %v1431_v55, 0.0  ;;  %v969_v46 = vmax.f32 %v919_v40, 0.0 }
 0x1f6   :  { %v1216_v13 = vpop.f32.mrf.mxu2 }
 0x1f7   :  { %v1541_v42 = vpack.c.bf16 %v1494_v12, %v1493_v37  ;;  %v1217_v38 = vadd.f32 %v1216_v13, %v3233_v47  ;;  %v995_v29 = vpack.c.bf16 %v969_v46, %v967_v9 }
 0x1f8   :  { %v1289_v10 = vpop.f32.mrf.mxu3  ;;  %v1359_v39 = vpop.f32.mrf.mxu0 }
 0x1f9   :  { %1566 = vst [vmem:[#allocation2 + $0x10] sm:$0xff] %v1541_v42  ;;  %v1360_v19 = vadd.f32 %v1359_v39, %v3240_v31  ;;  %v1432_v57 = vpop.f32.mrf.mxu1  ;;  %v1290_v1 = vadd.f32 %v1289_v10, %v1217_v38 }
 0x1fb   :  { %v1433_v6 = vadd.f32 %v1432_v57, %v1360_v19  ;;  %v1497_v15 = vmax.f32 %v1290_v1, 0.0 }
 0x1fd   :  { %v1496_v30 = vmax.f32 %v1433_v6, 0.0 }
 0x1fe   :  { %v1218_v45 = vpop.f32.mrf.mxu2 }
 0x1ff   :  { %v1542_v27 = vpack.c.bf16 %v1496_v30, %v1495_v33  ;;  %v1219_v35 = vadd.f32 %v1218_v45, %v3233_v47 }
 0x200   :  { %v1291_v24 = vpop.f32.mrf.mxu3  ;;  %v1362_v32 = vpop.f32.mrf.mxu0 }
 0x201   :  { %1567 = vst [vmem:[#allocation2 + $0x18] sm:$0xff] %v1542_v27  ;;  %v1363_v50 = vadd.f32 %v1362_v32, %v3240_v31  ;;  %v1435_v56 = vpop.f32.mrf.mxu1  ;;  %v1292_v8 = vadd.f32 %v1291_v24, %v1219_v35 }
 0x203   :  { %v1436_v16 = vadd.f32 %v1435_v56, %v1363_v50  ;;  %1260 = vmatmul.bf16.gmra.mxu2 %v995_v29  ;;  %1401 = vmatmul.bf16.gmra.mxu0 %v993_v59  ;;  %v971_v59 = vmax.f32 %v921_v61, 0.0  ;;  %v1499_v20 = vmax.f32 %v1292_v8, 0.0 }
 0x204   :  { %1474 = vmatmul.bf16.gmra.mxu1 %v994_v5  ;;  %v972_v5 = vmax.f32 %v922_v60, 0.0 }
 0x205   :  { %1333 = vmatmul.bf16.gmra.mxu3 %v996_v26  ;;  %v1498_v3 = vmax.f32 %v1436_v16, 0.0  ;;  %v997_v37 = vpack.c.bf16 %v971_v59, %v971_v59 }
 0x206   :  { %v1221_v28 = vpop.f32.mrf.mxu2  ;;  %v998_v12 = vpack.c.bf16 %v972_v5, %v972_v5 }
 0x207   :  { %v1543_v11 = vpack.c.bf16 %v1498_v3, %v1497_v15  ;;  %v1222_v4 = vadd.f32 %v1221_v28, %v3233_v47 }
 0x208   :  { %v1294_v25 = vpop.f32.mrf.mxu3  ;;  %v1364_v44 = vpop.f32.mrf.mxu0 }
 0x209   :  { %1568 = vst [vmem:[#allocation2 + $0x20] sm:$0xff] %v1543_v11  ;;  %v1365_v0 = vadd.f32 %v1364_v44, %v3240_v31  ;;  %v1437_v52 = vpop.f32.mrf.mxu1  ;;  %v1295_v54 = vadd.f32 %v1294_v25, %v1222_v4 }
 0x20b   :  { %v1438_v21 = vadd.f32 %v1437_v52, %v1365_v0  ;;  %v1501_v43 = vmax.f32 %v1295_v54, 0.0 }
 0x20d   :  { %v1500_v22 = vmax.f32 %v1438_v21, 0.0 }
 0x20e   :  { %v1223_v55 = vpop.f32.mrf.mxu2 }
 0x20f   :  { %v1544_v36 = vpack.c.bf16 %v1500_v22, %v1499_v20  ;;  %v1224_v13 = vadd.f32 %v1223_v55, %v3233_v47 }
 0x210   :  { %v1296_v62 = vpop.f32.mrf.mxu3  ;;  %v1367_v18 = vpop.f32.mrf.mxu0 }
 0x211   :  { %1569 = vst [vmem:[#allocation2 + $0x28] sm:$0xff] %v1544_v36  ;;  %v1368_v53 = vadd.f32 %v1367_v18, %v3240_v31  ;;  %v1440_v63 = vpop.f32.mrf.mxu1  ;;  %v1297_v48 = vadd.f32 %v1296_v62, %v1224_v13 }
 0x213   :  { %v1441_v58 = vadd.f32 %v1440_v63, %v1368_v53  ;;  %1265 = vmatmul.bf16.gmra.mxu2 %v997_v37  ;;  %1406 = vmatmul.bf16.gmra.mxu0 %v995_v29  ;;  %v1503_v49 = vmax.f32 %v1297_v48, 0.0 }
 0x214   :  { %1479 = vmatmul.bf16.gmra.mxu1 %v996_v26 }
 0x215   :  { %1338 = vmatmul.bf16.gmra.mxu3 %v998_v12  ;;  %v1502_v42 = vmax.f32 %v1441_v58, 0.0 }
 0x216   :  { %v1226_v10 = vpop.f32.mrf.mxu2 }
 0x217   :  { %v1545_v2 = vpack.c.bf16 %v1502_v42, %v1501_v43  ;;  %v1227_v6 = vadd.f32 %v1226_v10, %v3233_v47 }
 0x218   :  { %v1299_v39 = vpop.f32.mrf.mxu3  ;;  %v1369_v40 = vpop.f32.mrf.mxu0 }
 0x219   :  { %1570 = vst [vmem:[#allocation2 + $0x30] sm:$0xff] %v1545_v2  ;;  %v1370_v19 = vadd.f32 %v1369_v40, %v3240_v31  ;;  %v1442_v57 = vpop.f32.mrf.mxu1  ;;  %v1300_v41 = vadd.f32 %v1299_v39, %v1227_v6 }
 0x21b   :  { %v1443_v34 = vadd.f32 %v1442_v57, %v1370_v19  ;;  %v1505_v24 = vmax.f32 %v1300_v41, 0.0 }
 0x21d   :  { %v1504_v17 = vmax.f32 %v1443_v34, 0.0 }
 0x21e   :  { %v1228_v46 = vpop.f32.mrf.mxu2 }
 0x21f   :  { %v1546_v33 = vpack.c.bf16 %v1504_v17, %v1503_v49  ;;  %v1229_v51 = vadd.f32 %v1228_v46, %v3233_v47 }
 0x220   :  { %v1301_v38 = vpop.f32.mrf.mxu3  ;;  %v1372_v30 = vpop.f32.mrf.mxu0 }
 0x221   :  { %1571 = vst [vmem:[#allocation2 + $0x38] sm:$0xff] %v1546_v33  ;;  %v1373_v45 = vadd.f32 %v1372_v30, %v3240_v31  ;;  %v1445_v9 = vpop.f32.mrf.mxu1  ;;  %v1302_v23 = vadd.f32 %v1301_v38, %v1229_v51 }
 0x223   :  { %v1446_v27 = vadd.f32 %v1445_v9, %v1373_v45  ;;  %1411 = vmatmul.bf16.gmra.mxu0 %v997_v37  ;;  %v1507_v15 = vmax.f32 %v1302_v23, 0.0 }
 0x224   :  { %1484 = vmatmul.bf16.gmra.mxu1 %v998_v12 }
 0x225   :  { %v1506_v32 = vmax.f32 %v1446_v27, 0.0 }
 0x226   :  { %v1231_v1 = vpop.f32.mrf.mxu2 }
 0x227   :  { %v1547_v50 = vpack.c.bf16 %v1506_v32, %v1505_v24  ;;  %v1232_v35 = vadd.f32 %v1231_v1, %v3233_v47 }
 0x228   :  { %v1304_v56 = vpop.f32.mrf.mxu3  ;;  %v1374_v29 = vpop.f32.mrf.mxu0 }
 0x229   :  { %1572 = vst [vmem:[#allocation2 + $0x40] sm:$0xff] %v1547_v50  ;;  %v1375_v7 = vadd.f32 %v1374_v29, %v3240_v31  ;;  %v1447_v26 = vpop.f32.mrf.mxu1  ;;  %v1305_v44 = vadd.f32 %v1304_v56, %v1232_v35 }
 0x22b   :  { %v1448_v16 = vadd.f32 %v1447_v26, %v1375_v7  ;;  %v1509_v52 = vmax.f32 %v1305_v44, 0.0 }
 0x22d   :  { %v1508_v3 = vmax.f32 %v1448_v16, 0.0 }
 0x22e   :  { %v1233_v14 = vpop.f32.mrf.mxu2 }
 0x22f   :  { %v1548_v28 = vpack.c.bf16 %v1508_v3, %v1507_v15  ;;  %v1234_v60 = vadd.f32 %v1233_v14, %v3233_v47 }
 0x230   :  { %v1306_v11 = vpop.f32.mrf.mxu3  ;;  %v1377_v25 = vpop.f32.mrf.mxu0 }
 0x231   :  { %1573 = vst [vmem:[#allocation2 + $0x48] sm:$0xff] %v1548_v28  ;;  %v1378_v61 = vadd.f32 %v1377_v25, %v3240_v31  ;;  %v1450_v8 = vpop.f32.mrf.mxu1  ;;  %v1307_v5 = vadd.f32 %v1306_v11, %v1234_v60 }
 0x233   :  { %v1451_v0 = vadd.f32 %v1450_v8, %v1378_v61  ;;  %v1511_v18 = vmax.f32 %v1307_v5, 0.0 }
 0x235   :  { %v1510_v21 = vmax.f32 %v1451_v0, 0.0 }
 0x236   :  { %v1236_v59 = vpop.f32.mrf.mxu2 }
 0x237   :  { %v1549_v20 = vpack.c.bf16 %v1510_v21, %v1509_v52  ;;  %v1237_v37 = vadd.f32 %v1236_v59, %v3233_v47 }
 0x238   :  { %v1309_v4 = vpop.f32.mrf.mxu3  ;;  %v1379_v22 = vpop.f32.mrf.mxu0 }
 0x239   :  { %1574 = vst [vmem:[#allocation2 + $0x50] sm:$0xff] %v1549_v20  ;;  %v1380_v55 = vadd.f32 %v1379_v22, %v3240_v31  ;;  %v1452_v36 = vpop.f32.mrf.mxu1  ;;  %v1310_v43 = vadd.f32 %v1309_v4, %v1237_v37 }
 0x23b   :  { %v1453_v62 = vadd.f32 %v1452_v36, %v1380_v55  ;;  %v1513_v2 = vmax.f32 %v1310_v43, 0.0 }
 0x23d   :  { %v1512_v54 = vmax.f32 %v1453_v62, 0.0 }
 0x23e   :  { %v1238_v53 = vpop.f32.mrf.mxu2 }
 0x23f   :  { %v1550_v63 = vpack.c.bf16 %v1512_v54, %v1511_v18  ;;  %v1239_v39 = vadd.f32 %v1238_v53, %v3233_v47 }
 0x240   :  { %v1311_v12 = vpop.f32.mrf.mxu3  ;;  %v1382_v58 = vpop.f32.mrf.mxu0 }
 0x241   :  { %1575 = vst [vmem:[#allocation2 + $0x58] sm:$0xff] %v1550_v63  ;;  %v1383_v13 = vadd.f32 %v1382_v58, %v3240_v31  ;;  %v1455_v42 = vpop.f32.mrf.mxu1  ;;  %v1312_v49 = vadd.f32 %v1311_v12, %v1239_v39 }
 0x243   :  { %v1456_v10 = vadd.f32 %v1455_v42, %v1383_v13  ;;  %v1515_v33 = vmax.f32 %v1312_v49, 0.0 }
 0x245   :  { %v1514_v40 = vmax.f32 %v1456_v10, 0.0 }
 0x246   :  { %v1241_v48 = vpop.f32.mrf.mxu2 }
 0x247   :  { %v1551_v19 = vpack.c.bf16 %v1514_v40, %v1513_v2  ;;  %v1242_v38 = vadd.f32 %v1241_v48, %v3233_v47 }
 0x248   :  { %v1314_v57 = vpop.f32.mrf.mxu3  ;;  %v1384_v34 = vpop.f32.mrf.mxu0 }
 0x249   :  { %1576 = vst [vmem:[#allocation2 + $0x60] sm:$0xff] %v1551_v19  ;;  %v1385_v6 = vadd.f32 %v1384_v34, %v3240_v31  ;;  %v1457_v17 = vpop.f32.mrf.mxu1  ;;  %v1315_v24 = vadd.f32 %v1314_v57, %v1242_v38 }
 0x24b   :  { %v1458_v46 = vadd.f32 %v1457_v17, %v1385_v6  ;;  %v1517_v50 = vmax.f32 %v1315_v24, 0.0 }
 0x24d   :  { %v1516_v30 = vmax.f32 %v1458_v46, 0.0 }
 0x24e   :  { %v1243_v41 = vpop.f32.mrf.mxu2 }
 0x24f   :  { %v1552_v45 = vpack.c.bf16 %v1516_v30, %v1515_v33  ;;  %v1244_v56 = vadd.f32 %v1243_v41, %v3233_v47 }
 0x250   :  { %v1316_v9 = vpop.f32.mrf.mxu3  ;;  %v1387_v27 = vpop.f32.mrf.mxu0 }
 0x251   :  { %1577 = vst [vmem:[#allocation2 + $0x68] sm:$0xff] %v1552_v45  ;;  %v1388_v51 = vadd.f32 %v1387_v27, %v3240_v31  ;;  %v1460_v32 = vpop.f32.mrf.mxu1  ;;  %v1317_v15 = vadd.f32 %v1316_v9, %v1244_v56 }
 0x253   :  { %v1461_v1 = vadd.f32 %v1460_v32, %v1388_v51  ;;  %v1519_v28 = vmax.f32 %v1317_v15, 0.0 }
 0x255   :  { %v1518_v29 = vmax.f32 %v1461_v1, 0.0 }
 0x256   :  { %v1246_v23 = vpop.f32.mrf.mxu2 }
 0x257   :  { %v1553_v7 = vpack.c.bf16 %v1518_v29, %v1517_v50  ;;  %v1247_v11 = vadd.f32 %v1246_v23, %v3233_v47 }
 0x258   :  { %v1319_v26 = vpop.f32.mrf.mxu3  ;;  %v1389_v16 = vpop.f32.mrf.mxu0 }
 0x259   :  { %1578 = vst [vmem:[#allocation2 + $0x70] sm:$0xff] %v1553_v7  ;;  %v1390_v35 = vadd.f32 %v1389_v16, %v3240_v31  ;;  %v1462_v3 = vpop.f32.mrf.mxu1  ;;  %v1320_v52 = vadd.f32 %v1319_v26, %v1247_v11 }
 0x25b   :  { %v1463_v14 = vadd.f32 %v1462_v3, %v1390_v35  ;;  %v1521_v20 = vmax.f32 %v1320_v52, 0.0 }
 0x25d   :  { %v1520_v25 = vmax.f32 %v1463_v14, 0.0 }
 0x25e   :  { %v1248_v44 = vpop.f32.mrf.mxu2 }
 0x25f   :  { %v1554_v61 = vpack.c.bf16 %v1520_v25, %v1519_v28  ;;  %v1249_v4 = vadd.f32 %v1248_v44, %v3233_v47 }
 0x260   :  { %v1321_v8 = vpop.f32.mrf.mxu3  ;;  %v1392_v0 = vpop.f32.mrf.mxu0 }
 0x261   :  { %1579 = vst [vmem:[#allocation2 + $0x78] sm:$0xff] %v1554_v61  ;;  %v1393_v60 = vadd.f32 %v1392_v0, %v3240_v31  ;;  %v1465_v21 = vpop.f32.mrf.mxu1  ;;  %v1322_v18 = vadd.f32 %v1321_v8, %v1249_v4 }
 0x263   :  { %v1466_v59 = vadd.f32 %v1465_v21, %v1393_v60  ;;  %v1523_v63 = vmax.f32 %v1322_v18, 0.0 }
 0x265   :  { %v1522_v22 = vmax.f32 %v1466_v59, 0.0 }
 0x266   :  { %v1251_v5 = vpop.f32.mrf.mxu2 }
 0x267   :  { %v1555_v55 = vpack.c.bf16 %v1522_v22, %v1521_v20  ;;  %v1252_v12 = vadd.f32 %v1251_v5, %v3233_v47 }
 0x268   :  { %v1324_v36 = vpop.f32.mrf.mxu3  ;;  %v1394_v62 = vpop.f32.mrf.mxu0 }
 0x269   :  { %1580 = vst [vmem:[#allocation2 + $0x80] sm:$0xff] %v1555_v55  ;;  %v1395_v37 = vadd.f32 %v1394_v62, %v3240_v31  ;;  %v1467_v54 = vpop.f32.mrf.mxu1  ;;  %v1325_v2 = vadd.f32 %v1324_v36, %v1252_v12 }
 0x26b   :  { %v1468_v53 = vadd.f32 %v1467_v54, %v1395_v37  ;;  %v1525_v19 = vmax.f32 %v1325_v2, 0.0 }
 0x26d   :  { %v1524_v58 = vmax.f32 %v1468_v53, 0.0 }
 0x26e   :  { %v1253_v43 = vpop.f32.mrf.mxu2 }
 0x26f   :  { %v1556_v13 = vpack.c.bf16 %v1524_v58, %v1523_v63  ;;  %v1254_v57 = vadd.f32 %v1253_v43, %v3233_v47 }
 0x270   :  { %v1326_v42 = vpop.f32.mrf.mxu3  ;;  %v1397_v10 = vpop.f32.mrf.mxu0 }
 0x271   :  { %1581 = vst [vmem:[#allocation2 + $0x88] sm:$0xff] %v1556_v13  ;;  %v1398_v39 = vadd.f32 %v1397_v10, %v3240_v31  ;;  %v1470_v40 = vpop.f32.mrf.mxu1  ;;  %v1327_v33 = vadd.f32 %v1326_v42, %v1254_v57 }
 0x273   :  { %v1471_v48 = vadd.f32 %v1470_v40, %v1398_v39  ;;  %v1527_v45 = vmax.f32 %v1327_v33, 0.0 }
 0x275   :  { %v1526_v34 = vmax.f32 %v1471_v48, 0.0 }
 0x276   :  { %v1256_v49 = vpop.f32.mrf.mxu2 }
 0x277   :  { %v1557_v6 = vpack.c.bf16 %v1526_v34, %v1525_v19  ;;  %v1257_v9 = vadd.f32 %v1256_v49, %v3233_v47 }
 0x278   :  { %v1329_v17 = vpop.f32.mrf.mxu3  ;;  %v1399_v46 = vpop.f32.mrf.mxu0 }
 0x279   :  { %1582 = vst [vmem:[#allocation2 + $0x90] sm:$0xff] %v1557_v6  ;;  %v1400_v38 = vadd.f32 %v1399_v46, %v3240_v31  ;;  %v1472_v30 = vpop.f32.mrf.mxu1  ;;  %v1330_v50 = vadd.f32 %v1329_v17, %v1257_v9 }
 0x27b   :  { %v1473_v41 = vadd.f32 %v1472_v30, %v1400_v38  ;;  %v1529_v7 = vmax.f32 %v1330_v50, 0.0 }
 0x27d   :  { %v1528_v27 = vmax.f32 %v1473_v41, 0.0 }
 0x27e   :  { %v1258_v24 = vpop.f32.mrf.mxu2 }
 0x27f   :  { %v1558_v51 = vpack.c.bf16 %v1528_v27, %v1527_v45  ;;  %v1259_v26 = vadd.f32 %v1258_v24, %v3233_v47 }
 0x280   :  { %v1331_v32 = vpop.f32.mrf.mxu3  ;;  %v1402_v1 = vpop.f32.mrf.mxu0 }
 0x281   :  { %1583 = vst [vmem:[#allocation2 + $0x98] sm:$0xff] %v1558_v51  ;;  %v1403_v56 = vadd.f32 %v1402_v1, %v3240_v31  ;;  %v1475_v29 = vpop.f32.mrf.mxu1  ;;  %v1332_v28 = vadd.f32 %v1331_v32, %v1259_v26 }
 0x283   :  { %v1476_v23 = vadd.f32 %v1475_v29, %v1403_v56  ;;  %v1531_v61 = vmax.f32 %v1332_v28, 0.0 }
 0x285   :  { %v1530_v16 = vmax.f32 %v1476_v23, 0.0 }
 0x286   :  { %v1261_v15 = vpop.f32.mrf.mxu2 }
 0x287   :  { %v1559_v35 = vpack.c.bf16 %v1530_v16, %v1529_v7  ;;  %v1262_v8 = vadd.f32 %v1261_v15, %v3233_v47 }
 0x288   :  { %v1334_v3 = vpop.f32.mrf.mxu3  ;;  %v1404_v14 = vpop.f32.mrf.mxu0 }
 0x289   :  { %1584 = vst [vmem:[#allocation2 + $0xa0] sm:$0xff] %v1559_v35  ;;  %v1405_v11 = vadd.f32 %v1404_v14, %v3240_v31  ;;  %v1477_v25 = vpop.f32.mrf.mxu1  ;;  %v1335_v20 = vadd.f32 %v1334_v3, %v1262_v8 }
 0x28b   :  { %v1478_v44 = vadd.f32 %v1477_v25, %v1405_v11  ;;  %v1533_v55 = vmax.f32 %v1335_v20, 0.0 }
 0x28d   :  { %v1532_v0 = vmax.f32 %v1478_v44, 0.0 }
 0x28e   :  { %v1263_v52 = vpop.f32.mrf.mxu2 }
 0x28f   :  { %v1560_v60 = vpack.c.bf16 %v1532_v0, %v1531_v61  ;;  %v1264_v36 = vadd.f32 %v1263_v52, %v3233_v47 }
 0x290   :  { %v1336_v21 = vpop.f32.mrf.mxu3  ;;  %v1407_v59 = vpop.f32.mrf.mxu0 }
 0x291   :  { %1585 = vst [vmem:[#allocation2 + $0xa8] sm:$0xff] %v1560_v60  ;;  %v1408_v4 = vadd.f32 %v1407_v59, %v3240_v31  ;;  %v1480_v22 = vpop.f32.mrf.mxu1  ;;  %v1337_v63 = vadd.f32 %v1336_v21, %v1264_v36 }
 0x293   :  { %v1481_v5 = vadd.f32 %v1480_v22, %v1408_v4  ;;  %v1535_v13 = vmax.f32 %v1337_v63, 0.0 }
 0x295   :  { %v1534_v62 = vmax.f32 %v1481_v5, 0.0 }
 0x296   :  { %v1266_v18 = vpop.f32.mrf.mxu2 }
 0x297   :  { %v1561_v37 = vpack.c.bf16 %v1534_v62, %v1533_v55  ;;  %v1267_v42 = vadd.f32 %v1266_v18, %v3233_v47 }
 0x298   :  { %v1339_v54 = vpop.f32.mrf.mxu3  ;;  %v1409_v53 = vpop.f32.mrf.mxu0 }
 0x299   :  { %1586 = vst [vmem:[#allocation2 + $0xb0] sm:$0xff] %v1561_v37  ;;  %v1410_v12 = vadd.f32 %v1409_v53, %v3240_v31  ;;  %v1482_v58 = vpop.f32.mrf.mxu1  ;;  %v1340_v19 = vadd.f32 %v1339_v54, %v1267_v42 }
 0x29b   :  { %v1483_v43 = vadd.f32 %v1482_v58, %v1410_v12  ;;  %v1537_v6 = vmax.f32 %v1340_v19, 0.0 }
 0x29d   :  { %v1536_v10 = vmax.f32 %v1483_v43, 0.0 }
 0x29e   :  { %v1268_v2 = vpop.f32.mrf.mxu2 }
 0x29f   :  { %v1562_v39 = vpack.c.bf16 %v1536_v10, %v1535_v13 }
 0x2a0   :  { %v1341_v40 = vpop.f32.mrf.mxu3  ;;  %v1412_v48 = vpop.f32.mrf.mxu0 }
 0x2a1   :  { %1587 = vst [vmem:[#allocation2 + $0xb8] sm:$0xff] %v1562_v39  ;;  %v1413_v57 = vadd.f32 %v1412_v48, %v3240_v31  ;;  %v1485_v34 = vpop.f32.mrf.mxu1 }
 0x2a3   :  { %v1486_v49 = vadd.f32 %v1485_v34, %v1413_v57 }
 0x2a5   :  { %v1538_v17 = vmax.f32 %v1486_v49, 0.0 }
 0x2a7   :  { %v1563_v47 = vpack.c.bf16 %v1538_v17, %v1537_v6 }
 0x2a8   :  { %v1414_v46 = vpop.f32.mrf.mxu0 }
 0x2a9   :  { %1588 = vst [vmem:[#allocation2 + $0xc0] sm:$0xff] %v1563_v47  ;;  %v1487_v33 = vpop.f32.mrf.mxu1 }
 0x2aa   :  { %1601 = dma.vmem_to_hbm [thread:$0]  %s1594_s25, 3200, %s1596_s1, [#allocation3], %s2053_s27, %s2053_s27, %s2054_s28  }
 0x2ab   :  { %2050 = dma.done.wait [#allocation3], 3200  }
 0x2ac   :  { %2051 = vsyncadd [#allocation3], 4294964096 }
 0x2ad   :  { %1606 = vsyncpa [#allocation3], 1 }

</bundles_post_ra>
